<compile_context>
chip_gen: v7x
topology: tpu7x:2x2x1
jax: 0.10.0
libtpu: 0.0.40
codegen_flags: <defaults>
</compile_context>

<pallas_src>
import functools

import jax
import jax.numpy as jnp
from jax.experimental import pallas as pl
from jax.experimental.pallas import tpu as pltpu

LANE = 128   # per-gate / classifier padded lane width
BP = 8       # batch rows padded per timestep (one f32 sublane tile)


def rnn_ttlc_kernel(x_ref,      # (T*BP, Dp)          f32, seq-major, batch padded to BP rows
                    whh_ref,    # (LANE, 4*LANE)      bf16, gate-padded weight_hh_l0.T (i,f,o,g)
                    misc_ref,   # (8+Dp+LANE, 4*LANE) f32 packed small operands (see packer)
                    out_ref,    # (BP, LANE)          f32 lane-dense; sliced to (B, C) outside
                    gx_ref,     # VMEM scratch (T*BP, 4*LANE) f32: hoisted input projection
                    *, seq_len, in_dim_pad):
    T, HP, Dp = seq_len, LANE, in_dim_pad
    W0 = 8 + Dp                      # row offset of the classifier weights in misc

    # ---- Prologue: hoisted input projection, one matmul over all timesteps,
    # LSTM bias folded in, result staged in VMEM scratch (not held in vregs).
    wih = misc_ref[8:8 + Dp, :].astype(jnp.bfloat16)                 # (Dp, 4*HP)
    b_lstm = misc_ref[0:8, :][0:1, :]                                # (1, 4*HP)
    gx_ref[...] = (jnp.dot(x_ref[...].astype(jnp.bfloat16), wih,
                           preferred_element_type=jnp.float32) + b_lstm)

    h = jnp.zeros((BP, HP), jnp.float32)
    c = jnp.zeros((BP, HP), jnp.float32)

    # ---- Fully unrolled recurrence (T small & static).  Per step only
    # h @ whh remains; whh and the gx slice are re-read from VMEM each step.
    for t in range(T):
        gates = gx_ref[t * BP:(t + 1) * BP, :] + jnp.dot(
            h.astype(jnp.bfloat16), whh_ref[...],
            preferred_element_type=jnp.float32)                      # (BP, 4*HP)
        # Gate blocks packed (i, f, o, g): one fused sigmoid, one tanh.
        sig = jax.nn.sigmoid(gates[:, 0:3 * HP])
        i_g = sig[:, 0 * HP:1 * HP]
        f_g = sig[:, 1 * HP:2 * HP]
        o_g = sig[:, 2 * HP:3 * HP]
        g_g = jnp.tanh(gates[:, 3 * HP:4 * HP])
        c = f_g * c + i_g * g_g
        h = o_g * jnp.tanh(c)

    # ---- Classifier: Linear(H, E) -> Tanh -> Linear(E, C), lane-padded to 128.
    head = misc_ref[0:8, :]
    b1 = head[1:2, 0:HP]
    b2 = head[1:2, HP:2 * HP]
    w1 = misc_ref[W0:W0 + HP, 0:HP].astype(jnp.bfloat16)             # (HP, EP)
    w2 = misc_ref[W0:W0 + HP, HP:2 * HP].astype(jnp.bfloat16)        # (EP, CP)
    z = jnp.tanh(jnp.dot(h.astype(jnp.bfloat16), w1,
                         preferred_element_type=jnp.float32) + b1)
    out_ref[...] = (jnp.dot(z.astype(jnp.bfloat16), w2,
                            preferred_element_type=jnp.float32) + b2)


def rnn_ttlc_forward(x, kparams):
    """x: (B, T, D) batch_first, like the PyTorch module.  Returns (B, C)."""
    B, T, D = x.shape
    C = kparams["num_classes"]
    Dp = kparams["in_dim_pad"]
    assert B <= BP, "toy kernel assumes batch <= 8 (one sublane tile)"

    # batch_first -> seq-major; pad batch to BP rows and D to Dp columns so
    # every per-step slice inside the kernel is (8,128)-tile aligned.
    xp = jnp.zeros((T, BP, Dp), jnp.float32)
    xp = xp.at[:, :B, :D].set(jnp.transpose(x, (1, 0, 2)).astype(jnp.float32))
    x2d = xp.reshape(T * BP, Dp)

    vmem = pl.BlockSpec(memory_space=pltpu.MemorySpace.VMEM)
    fn = pl.pallas_call(
        functools.partial(rnn_ttlc_kernel, seq_len=T, in_dim_pad=Dp),
        out_shape=jax.ShapeDtypeStruct((BP, LANE), jnp.float32),
        in_specs=[vmem, vmem, vmem],
        out_specs=vmem,
        scratch_shapes=[pltpu.VMEM((T * BP, 4 * LANE), jnp.float32)],
    )
    out_p = fn(x2d, kparams["whh_p"], kparams["misc_p"])
    return out_p[:B, :C]


def make_params(key, input_dim, hidden_dim, embedding_dim, num_classes):
    """Deterministic parameter init mirroring the PyTorch module's shapes.

    nn.LSTM(input_dim, hidden_dim, num_layers=1, bias=True, batch_first=True):
        weight_ih_l0: (4H, D), weight_hh_l0: (4H, H), bias_ih/hh_l0: (4H,)
    classifier: Linear(H, E), Tanh, Linear(E, num_classes)
    Returns un-padded, pre-transposed f32 params (used by the reference).
    """
    ks = jax.random.split(key, 8)
    H, D, E, C = hidden_dim, input_dim, embedding_dim, num_classes

    def unif(k, shape, bound):
        return jax.random.uniform(k, shape, jnp.float32, -bound, bound)

    s_lstm = 1.0 / jnp.sqrt(H)
    w_ih = unif(ks[0], (4 * H, D), s_lstm)
    w_hh = unif(ks[1], (4 * H, H), s_lstm)
    b_ih = unif(ks[2], (4 * H,), s_lstm)
    b_hh = unif(ks[3], (4 * H,), s_lstm)

    s1 = 1.0 / jnp.sqrt(H)
    w1 = unif(ks[4], (E, H), s1)
    b1 = unif(ks[5], (E,), s1)
    s2 = 1.0 / jnp.sqrt(E)
    w2 = unif(ks[6], (C, E), s2)
    b2 = unif(ks[7], (C,), s2)

    return {
        "wih_t": w_ih.T,                              # (D, 4H)
        "whh_t": w_hh.T,                              # (H, 4H)
        "b_lstm": (b_ih + b_hh).reshape(1, 4 * H),    # (1, 4H)
        "w1_t": w1.T,                                 # (H, E)
        "b1": b1.reshape(1, E),
        "w2_t": w2.T,                                 # (E, C)
        "b2": b2.reshape(1, C),
    }


def pad_params_for_kernel(p, input_dim, hidden_dim):
    """Pack the kernel operands into two arrays:

      whh_p : (LANE, 4*LANE) bf16, gate-padded weight_hh_l0.T, gates (i,f,o,g)
      misc_p: (8 + Dp + LANE, 4*LANE) f32
              row 0            : LSTM gate bias (b_ih + b_hh), gate-padded
              row 1            : [ b1 (128 lanes) | b2 (128 lanes) | 0 ]
              rows 8..8+Dp-1   : weight_ih_l0.T gate-padded (rows D..Dp-1 zero)
              rows 8+Dp..      : [ classifier[0].weight.T (128x128)
                                 | classifier[2].weight.T (128x128) ]
    """
    H, D, HP = hidden_dim, input_dim, LANE
    E = p["w1_t"].shape[1]
    C = p["w2_t"].shape[1]
    Dp = ((D + 7) // 8) * 8

    # PyTorch gate order (i, f, g, o)  ->  packed block order (i, f, o, g),
    # each gate padded to its own 128-lane block (zero padding keeps the
    # padded lanes at h = c = 0 exactly).
    def pad_gates(w):                       # (R, 4H) -> (R, 4*HP)
        out = jnp.zeros((w.shape[0], 4 * HP), w.dtype)
        for dst, src in enumerate((0, 1, 3, 2)):
            out = out.at[:, dst * HP:dst * HP + H].set(w[:, src * H:(src + 1) * H])
        return out

    whh_p = jnp.zeros((HP, 4 * HP), jnp.float32)
    whh_p = whh_p.at[:H, :].set(pad_gates(p["whh_t"])).astype(jnp.bfloat16)

    misc = jnp.zeros((8 + Dp + HP, 4 * HP), jnp.float32)
    misc = misc.at[0:1, :].set(pad_gates(p["b_lstm"]))
    misc = misc.at[1, 0:E].set(p["b1"][0])
    misc = misc.at[1, HP:HP + C].set(p["b2"][0])
    misc = misc.at[8:8 + D, :].set(pad_gates(p["wih_t"]))
    misc = misc.at[8 + Dp:8 + Dp + H, 0:E].set(p["w1_t"])
    misc = misc.at[8 + Dp:8 + Dp + E, HP:HP + C].set(p["w2_t"])

    return {"whh_p": whh_p, "misc_p": misc,
            "num_classes": C, "in_dim_pad": Dp}


def reference_forward(x, p):
    """Pure-JAX reference mirroring the kernel's precision: bf16 matmul
    operands with f32 accumulation; state / activations / biases in f32."""
    B, T, _ = x.shape
    H = p["whh_t"].shape[0]
    bf = lambda a: a.astype(jnp.bfloat16)

    wih, whh = bf(p["wih_t"]), bf(p["whh_t"])
    h = jnp.zeros((B, H), jnp.float32)
    c = jnp.zeros((B, H), jnp.float32)
    for t in range(T):
        gates = (jnp.dot(bf(x[:, t, :]), wih, preferred_element_type=jnp.float32)
                 + jnp.dot(bf(h), whh, preferred_element_type=jnp.float32)
                 + p["b_lstm"])
        i_g = jax.nn.sigmoid(gates[:, 0 * H:1 * H])
        f_g = jax.nn.sigmoid(gates[:, 1 * H:2 * H])
        g_g = jnp.tanh(gates[:, 2 * H:3 * H])
        o_g = jax.nn.sigmoid(gates[:, 3 * H:4 * H])
        c = f_g * c + i_g * g_g
        h = o_g * jnp.tanh(c)
    z = jnp.tanh(jnp.dot(bf(h), bf(p["w1_t"]), preferred_element_type=jnp.float32)
                 + p["b1"])
    return jnp.dot(bf(z), bf(p["w2_t"]), preferred_element_type=jnp.float32) + p["b2"]


if __name__ == "__main__":
    # Small shapes consistent with the module:
    # batch=2, seq=8, input_dim=8, hidden_dim=32, embedding_dim=16, classes=17
    B, T, D = 2, 8, 8
    H, E, C = 32, 16, 17

    key = jax.random.PRNGKey(0)
    kx, kp = jax.random.split(key)
    x = jax.random.normal(kx, (B, T, D), jnp.float32)
    raw_params = make_params(kp, input_dim=D, hidden_dim=H,
                             embedding_dim=E, num_classes=C)
    kernel_params = pad_params_for_kernel(raw_params, input_dim=D, hidden_dim=H)

    out = rnn_ttlc_forward(x, kernel_params)
    out = jax.block_until_ready(out)

    ref = reference_forward(x, raw_params)
    assert out.shape == (B, C)
    assert jnp.allclose(out, ref, atol=2e-3, rtol=2e-3), "mismatch vs reference"

    print("KERNEL_OK")
</pallas_src>

<mosaic_0001>
module attributes {stable_mosaic.version = 11 : i64} {
  func.func @rnn_ttlc_kernel(%arg0: memref<64x8xf32, #tpu.memory_space<vmem>>, %arg1: memref<128x512xbf16, #tpu.memory_space<vmem>>, %arg2: memref<144x512xf32, #tpu.memory_space<vmem>>, %arg3: memref<8x128xf32, #tpu.memory_space<vmem>>, %arg4: memref<64x512xf32, #tpu.memory_space<vmem>>) attributes {dimension_semantics = [], scalar_prefetch = 0 : i64, scratch_operands = 1 : i64, tpu.core_type = #tpu.core_type<tc>} {
    %c8 = arith.constant 8 : index
    %c0 = arith.constant 0 : index
    %0 = vector.load %arg2[%c8, %c0] : memref<144x512xf32, #tpu.memory_space<vmem>>, vector<8x512xf32>
    %1 = arith.truncf %0 : vector<8x512xf32> to vector<8x512xbf16>
    %c0_0 = arith.constant 0 : index
    %c0_1 = arith.constant 0 : index
    %2 = vector.load %arg2[%c0_0, %c0_1] : memref<144x512xf32, #tpu.memory_space<vmem>>, vector<8x512xf32>
    %3 = vector.extract_strided_slice %2 {offsets = [0, 0], sizes = [1, 512], strides = [1, 1]} : vector<8x512xf32> to vector<1x512xf32>
    %c0_2 = arith.constant 0 : index
    %c0_3 = arith.constant 0 : index
    %4 = vector.load %arg0[%c0_2, %c0_3] : memref<64x8xf32, #tpu.memory_space<vmem>>, vector<64x8xf32>
    %5 = arith.truncf %4 : vector<64x8xf32> to vector<64x8xbf16>
    %cst = arith.constant dense<0.000000e+00> : vector<64x512xf32>
    %6 = tpu.matmul %5, %1, %cst {dimension_numbers = #tpu.dot_dimension_numbers<[1], [0], [0], [1], [0, 0, 1, 1], [], []>} : vector<64x8xbf16>, vector<8x512xbf16>, vector<64x512xf32> -> vector<64x512xf32>
    %7 = vector.broadcast %3 : vector<1x512xf32> to vector<64x512xf32>
    %8 = arith.addf %6, %7 : vector<64x512xf32>
    %c0_4 = arith.constant 0 : index
    %c0_5 = arith.constant 0 : index
    %9 = vector.load %arg4[%c0_4, %c0_5] : memref<64x512xf32, #tpu.memory_space<vmem>>, vector<64x512xf32>
    tpu.vector_store %arg4[%c0_4, %c0_5], %8 {strides = array<i32>} : memref<64x512xf32, #tpu.memory_space<vmem>>, vector<64x512xf32>,
    %cst_6 = arith.constant 0.000000e+00 : f32
    %10 = vector.broadcast %cst_6 : f32 to vector<8x128xf32>
    %cst_7 = arith.constant 0.000000e+00 : f32
    %11 = vector.broadcast %cst_7 : f32 to vector<8x128xf32>
    %c0_8 = arith.constant 0 : index
    %c0_9 = arith.constant 0 : index
    %12 = vector.load %arg4[%c0_8, %c0_9] : memref<64x512xf32, #tpu.memory_space<vmem>>, vector<8x512xf32>
    %13 = arith.truncf %10 : vector<8x128xf32> to vector<8x128xbf16>
    %c0_10 = arith.constant 0 : index
    %c0_11 = arith.constant 0 : index
    %14 = vector.load %arg1[%c0_10, %c0_11] : memref<128x512xbf16, #tpu.memory_space<vmem>>, vector<128x512xbf16>
    %cst_12 = arith.constant dense<0.000000e+00> : vector<8x512xf32>
    %15 = tpu.matmul %13, %14, %cst_12 {dimension_numbers = #tpu.dot_dimension_numbers<[1], [0], [0], [1], [0, 0, 1, 1], [], []>} : vector<8x128xbf16>, vector<128x512xbf16>, vector<8x512xf32> -> vector<8x512xf32>
    %16 = arith.addf %12, %15 : vector<8x512xf32>
    %17 = vector.extract_strided_slice %16 {offsets = [0, 0], sizes = [8, 384], strides = [1, 1]} : vector<8x512xf32> to vector<8x384xf32>
    %18 = arith.negf %17 : vector<8x384xf32>
    %19 = math.exp %18 : vector<8x384xf32>
    %cst_13 = arith.constant 1.000000e+00 : f32
    %20 = vector.broadcast %cst_13 : f32 to vector<8x384xf32>
    %21 = arith.addf %20, %19 : vector<8x384xf32>
    %22 = arith.divf %20, %21 : vector<8x384xf32>
    %23 = vector.extract_strided_slice %22 {offsets = [0, 0], sizes = [8, 128], strides = [1, 1]} : vector<8x384xf32> to vector<8x128xf32>
    %24 = vector.extract_strided_slice %22 {offsets = [0, 128], sizes = [8, 128], strides = [1, 1]} : vector<8x384xf32> to vector<8x128xf32>
    %25 = vector.extract_strided_slice %22 {offsets = [0, 256], sizes = [8, 128], strides = [1, 1]} : vector<8x384xf32> to vector<8x128xf32>
    %26 = vector.extract_strided_slice %16 {offsets = [0, 384], sizes = [8, 128], strides = [1, 1]} : vector<8x512xf32> to vector<8x128xf32>
    %27 = math.tanh %26 : vector<8x128xf32>
    %28 = arith.mulf %24, %11 : vector<8x128xf32>
    %29 = arith.mulf %23, %27 : vector<8x128xf32>
    %30 = arith.addf %28, %29 : vector<8x128xf32>
    %31 = math.tanh %30 : vector<8x128xf32>
    %32 = arith.mulf %25, %31 : vector<8x128xf32>
    %c8_14 = arith.constant 8 : index
    %c0_15 = arith.constant 0 : index
    %33 = vector.load %arg4[%c8_14, %c0_15] : memref<64x512xf32, #tpu.memory_space<vmem>>, vector<8x512xf32>
    %34 = arith.truncf %32 : vector<8x128xf32> to vector<8x128xbf16>
    %c0_16 = arith.constant 0 : index
    %c0_17 = arith.constant 0 : index
    %35 = vector.load %arg1[%c0_16, %c0_17] : memref<128x512xbf16, #tpu.memory_space<vmem>>, vector<128x512xbf16>
    %cst_18 = arith.constant dense<0.000000e+00> : vector<8x512xf32>
    %36 = tpu.matmul %34, %35, %cst_18 {dimension_numbers = #tpu.dot_dimension_numbers<[1], [0], [0], [1], [0, 0, 1, 1], [], []>} : vector<8x128xbf16>, vector<128x512xbf16>, vector<8x512xf32> -> vector<8x512xf32>
    %37 = arith.addf %33, %36 : vector<8x512xf32>
    %38 = vector.extract_strided_slice %37 {offsets = [0, 0], sizes = [8, 384], strides = [1, 1]} : vector<8x512xf32> to vector<8x384xf32>
    %39 = arith.negf %38 : vector<8x384xf32>
    %40 = math.exp %39 : vector<8x384xf32>
    %cst_19 = arith.constant 1.000000e+00 : f32
    %41 = vector.broadcast %cst_19 : f32 to vector<8x384xf32>
    %42 = arith.addf %41, %40 : vector<8x384xf32>
    %43 = arith.divf %41, %42 : vector<8x384xf32>
    %44 = vector.extract_strided_slice %43 {offsets = [0, 0], sizes = [8, 128], strides = [1, 1]} : vector<8x384xf32> to vector<8x128xf32>
    %45 = vector.extract_strided_slice %43 {offsets = [0, 128], sizes = [8, 128], strides = [1, 1]} : vector<8x384xf32> to vector<8x128xf32>
    %46 = vector.extract_strided_slice %43 {offsets = [0, 256], sizes = [8, 128], strides = [1, 1]} : vector<8x384xf32> to vector<8x128xf32>
    %47 = vector.extract_strided_slice %37 {offsets = [0, 384], sizes = [8, 128], strides = [1, 1]} : vector<8x512xf32> to vector<8x128xf32>
    %48 = math.tanh %47 : vector<8x128xf32>
    %49 = arith.mulf %45, %30 : vector<8x128xf32>
    %50 = arith.mulf %44, %48 : vector<8x128xf32>
    %51 = arith.addf %49, %50 : vector<8x128xf32>
    %52 = math.tanh %51 : vector<8x128xf32>
    %53 = arith.mulf %46, %52 : vector<8x128xf32>
    %c16 = arith.constant 16 : index
    %c0_20 = arith.constant 0 : index
    %54 = vector.load %arg4[%c16, %c0_20] : memref<64x512xf32, #tpu.memory_space<vmem>>, vector<8x512xf32>
    %55 = arith.truncf %53 : vector<8x128xf32> to vector<8x128xbf16>
    %c0_21 = arith.constant 0 : index
    %c0_22 = arith.constant 0 : index
    %56 = vector.load %arg1[%c0_21, %c0_22] : memref<128x512xbf16, #tpu.memory_space<vmem>>, vector<128x512xbf16>
    %cst_23 = arith.constant dense<0.000000e+00> : vector<8x512xf32>
    %57 = tpu.matmul %55, %56, %cst_23 {dimension_numbers = #tpu.dot_dimension_numbers<[1], [0], [0], [1], [0, 0, 1, 1], [], []>} : vector<8x128xbf16>, vector<128x512xbf16>, vector<8x512xf32> -> vector<8x512xf32>
    %58 = arith.addf %54, %57 : vector<8x512xf32>
    %59 = vector.extract_strided_slice %58 {offsets = [0, 0], sizes = [8, 384], strides = [1, 1]} : vector<8x512xf32> to vector<8x384xf32>
    %60 = arith.negf %59 : vector<8x384xf32>
    %61 = math.exp %60 : vector<8x384xf32>
    %cst_24 = arith.constant 1.000000e+00 : f32
    %62 = vector.broadcast %cst_24 : f32 to vector<8x384xf32>
    %63 = arith.addf %62, %61 : vector<8x384xf32>
    %64 = arith.divf %62, %63 : vector<8x384xf32>
    %65 = vector.extract_strided_slice %64 {offsets = [0, 0], sizes = [8, 128], strides = [1, 1]} : vector<8x384xf32> to vector<8x128xf32>
    %66 = vector.extract_strided_slice %64 {offsets = [0, 128], sizes = [8, 128], strides = [1, 1]} : vector<8x384xf32> to vector<8x128xf32>
    %67 = vector.extract_strided_slice %64 {offsets = [0, 256], sizes = [8, 128], strides = [1, 1]} : vector<8x384xf32> to vector<8x128xf32>
    %68 = vector.extract_strided_slice %58 {offsets = [0, 384], sizes = [8, 128], strides = [1, 1]} : vector<8x512xf32> to vector<8x128xf32>
    %69 = math.tanh %68 : vector<8x128xf32>
    %70 = arith.mulf %66, %51 : vector<8x128xf32>
    %71 = arith.mulf %65, %69 : vector<8x128xf32>
    %72 = arith.addf %70, %71 : vector<8x128xf32>
    %73 = math.tanh %72 : vector<8x128xf32>
    %74 = arith.mulf %67, %73 : vector<8x128xf32>
    %c24 = arith.constant 24 : index
    %c0_25 = arith.constant 0 : index
    %75 = vector.load %arg4[%c24, %c0_25] : memref<64x512xf32, #tpu.memory_space<vmem>>, vector<8x512xf32>
    %76 = arith.truncf %74 : vector<8x128xf32> to vector<8x128xbf16>
    %c0_26 = arith.constant 0 : index
    %c0_27 = arith.constant 0 : index
    %77 = vector.load %arg1[%c0_26, %c0_27] : memref<128x512xbf16, #tpu.memory_space<vmem>>, vector<128x512xbf16>
    %cst_28 = arith.constant dense<0.000000e+00> : vector<8x512xf32>
    %78 = tpu.matmul %76, %77, %cst_28 {dimension_numbers = #tpu.dot_dimension_numbers<[1], [0], [0], [1], [0, 0, 1, 1], [], []>} : vector<8x128xbf16>, vector<128x512xbf16>, vector<8x512xf32> -> vector<8x512xf32>
    %79 = arith.addf %75, %78 : vector<8x512xf32>
    %80 = vector.extract_strided_slice %79 {offsets = [0, 0], sizes = [8, 384], strides = [1, 1]} : vector<8x512xf32> to vector<8x384xf32>
    %81 = arith.negf %80 : vector<8x384xf32>
    %82 = math.exp %81 : vector<8x384xf32>
    %cst_29 = arith.constant 1.000000e+00 : f32
    %83 = vector.broadcast %cst_29 : f32 to vector<8x384xf32>
    %84 = arith.addf %83, %82 : vector<8x384xf32>
    %85 = arith.divf %83, %84 : vector<8x384xf32>
    %86 = vector.extract_strided_slice %85 {offsets = [0, 0], sizes = [8, 128], strides = [1, 1]} : vector<8x384xf32> to vector<8x128xf32>
    %87 = vector.extract_strided_slice %85 {offsets = [0, 128], sizes = [8, 128], strides = [1, 1]} : vector<8x384xf32> to vector<8x128xf32>
    %88 = vector.extract_strided_slice %85 {offsets = [0, 256], sizes = [8, 128], strides = [1, 1]} : vector<8x384xf32> to vector<8x128xf32>
    %89 = vector.extract_strided_slice %79 {offsets = [0, 384], sizes = [8, 128], strides = [1, 1]} : vector<8x512xf32> to vector<8x128xf32>
    %90 = math.tanh %89 : vector<8x128xf32>
    %91 = arith.mulf %87, %72 : vector<8x128xf32>
    %92 = arith.mulf %86, %90 : vector<8x128xf32>
    %93 = arith.addf %91, %92 : vector<8x128xf32>
    %94 = math.tanh %93 : vector<8x128xf32>
    %95 = arith.mulf %88, %94 : vector<8x128xf32>
    %c32 = arith.constant 32 : index
    %c0_30 = arith.constant 0 : index
    %96 = vector.load %arg4[%c32, %c0_30] : memref<64x512xf32, #tpu.memory_space<vmem>>, vector<8x512xf32>
    %97 = arith.truncf %95 : vector<8x128xf32> to vector<8x128xbf16>
    %c0_31 = arith.constant 0 : index
    %c0_32 = arith.constant 0 : index
    %98 = vector.load %arg1[%c0_31, %c0_32] : memref<128x512xbf16, #tpu.memory_space<vmem>>, vector<128x512xbf16>
    %cst_33 = arith.constant dense<0.000000e+00> : vector<8x512xf32>
    %99 = tpu.matmul %97, %98, %cst_33 {dimension_numbers = #tpu.dot_dimension_numbers<[1], [0], [0], [1], [0, 0, 1, 1], [], []>} : vector<8x128xbf16>, vector<128x512xbf16>, vector<8x512xf32> -> vector<8x512xf32>
    %100 = arith.addf %96, %99 : vector<8x512xf32>
    %101 = vector.extract_strided_slice %100 {offsets = [0, 0], sizes = [8, 384], strides = [1, 1]} : vector<8x512xf32> to vector<8x384xf32>
    %102 = arith.negf %101 : vector<8x384xf32>
    %103 = math.exp %102 : vector<8x384xf32>
    %cst_34 = arith.constant 1.000000e+00 : f32
    %104 = vector.broadcast %cst_34 : f32 to vector<8x384xf32>
    %105 = arith.addf %104, %103 : vector<8x384xf32>
    %106 = arith.divf %104, %105 : vector<8x384xf32>
    %107 = vector.extract_strided_slice %106 {offsets = [0, 0], sizes = [8, 128], strides = [1, 1]} : vector<8x384xf32> to vector<8x128xf32>
    %108 = vector.extract_strided_slice %106 {offsets = [0, 128], sizes = [8, 128], strides = [1, 1]} : vector<8x384xf32> to vector<8x128xf32>
    %109 = vector.extract_strided_slice %106 {offsets = [0, 256], sizes = [8, 128], strides = [1, 1]} : vector<8x384xf32> to vector<8x128xf32>
    %110 = vector.extract_strided_slice %100 {offsets = [0, 384], sizes = [8, 128], strides = [1, 1]} : vector<8x512xf32> to vector<8x128xf32>
    %111 = math.tanh %110 : vector<8x128xf32>
    %112 = arith.mulf %108, %93 : vector<8x128xf32>
    %113 = arith.mulf %107, %111 : vector<8x128xf32>
    %114 = arith.addf %112, %113 : vector<8x128xf32>
    %115 = math.tanh %114 : vector<8x128xf32>
    %116 = arith.mulf %109, %115 : vector<8x128xf32>
    %c40 = arith.constant 40 : index
    %c0_35 = arith.constant 0 : index
    %117 = vector.load %arg4[%c40, %c0_35] : memref<64x512xf32, #tpu.memory_space<vmem>>, vector<8x512xf32>
    %118 = arith.truncf %116 : vector<8x128xf32> to vector<8x128xbf16>
    %c0_36 = arith.constant 0 : index
    %c0_37 = arith.constant 0 : index
    %119 = vector.load %arg1[%c0_36, %c0_37] : memref<128x512xbf16, #tpu.memory_space<vmem>>, vector<128x512xbf16>
    %cst_38 = arith.constant dense<0.000000e+00> : vector<8x512xf32>
    %120 = tpu.matmul %118, %119, %cst_38 {dimension_numbers = #tpu.dot_dimension_numbers<[1], [0], [0], [1], [0, 0, 1, 1], [], []>} : vector<8x128xbf16>, vector<128x512xbf16>, vector<8x512xf32> -> vector<8x512xf32>
    %121 = arith.addf %117, %120 : vector<8x512xf32>
    %122 = vector.extract_strided_slice %121 {offsets = [0, 0], sizes = [8, 384], strides = [1, 1]} : vector<8x512xf32> to vector<8x384xf32>
    %123 = arith.negf %122 : vector<8x384xf32>
    %124 = math.exp %123 : vector<8x384xf32>
    %cst_39 = arith.constant 1.000000e+00 : f32
    %125 = vector.broadcast %cst_39 : f32 to vector<8x384xf32>
    %126 = arith.addf %125, %124 : vector<8x384xf32>
    %127 = arith.divf %125, %126 : vector<8x384xf32>
    %128 = vector.extract_strided_slice %127 {offsets = [0, 0], sizes = [8, 128], strides = [1, 1]} : vector<8x384xf32> to vector<8x128xf32>
    %129 = vector.extract_strided_slice %127 {offsets = [0, 128], sizes = [8, 128], strides = [1, 1]} : vector<8x384xf32> to vector<8x128xf32>
    %130 = vector.extract_strided_slice %127 {offsets = [0, 256], sizes = [8, 128], strides = [1, 1]} : vector<8x384xf32> to vector<8x128xf32>
    %131 = vector.extract_strided_slice %121 {offsets = [0, 384], sizes = [8, 128], strides = [1, 1]} : vector<8x512xf32> to vector<8x128xf32>
    %132 = math.tanh %131 : vector<8x128xf32>
    %133 = arith.mulf %129, %114 : vector<8x128xf32>
    %134 = arith.mulf %128, %132 : vector<8x128xf32>
    %135 = arith.addf %133, %134 : vector<8x128xf32>
    %136 = math.tanh %135 : vector<8x128xf32>
    %137 = arith.mulf %130, %136 : vector<8x128xf32>
    %c48 = arith.constant 48 : index
    %c0_40 = arith.constant 0 : index
    %138 = vector.load %arg4[%c48, %c0_40] : memref<64x512xf32, #tpu.memory_space<vmem>>, vector<8x512xf32>
    %139 = arith.truncf %137 : vector<8x128xf32> to vector<8x128xbf16>
    %c0_41 = arith.constant 0 : index
    %c0_42 = arith.constant 0 : index
    %140 = vector.load %arg1[%c0_41, %c0_42] : memref<128x512xbf16, #tpu.memory_space<vmem>>, vector<128x512xbf16>
    %cst_43 = arith.constant dense<0.000000e+00> : vector<8x512xf32>
    %141 = tpu.matmul %139, %140, %cst_43 {dimension_numbers = #tpu.dot_dimension_numbers<[1], [0], [0], [1], [0, 0, 1, 1], [], []>} : vector<8x128xbf16>, vector<128x512xbf16>, vector<8x512xf32> -> vector<8x512xf32>
    %142 = arith.addf %138, %141 : vector<8x512xf32>
    %143 = vector.extract_strided_slice %142 {offsets = [0, 0], sizes = [8, 384], strides = [1, 1]} : vector<8x512xf32> to vector<8x384xf32>
    %144 = arith.negf %143 : vector<8x384xf32>
    %145 = math.exp %144 : vector<8x384xf32>
    %cst_44 = arith.constant 1.000000e+00 : f32
    %146 = vector.broadcast %cst_44 : f32 to vector<8x384xf32>
    %147 = arith.addf %146, %145 : vector<8x384xf32>
    %148 = arith.divf %146, %147 : vector<8x384xf32>
    %149 = vector.extract_strided_slice %148 {offsets = [0, 0], sizes = [8, 128], strides = [1, 1]} : vector<8x384xf32> to vector<8x128xf32>
    %150 = vector.extract_strided_slice %148 {offsets = [0, 128], sizes = [8, 128], strides = [1, 1]} : vector<8x384xf32> to vector<8x128xf32>
    %151 = vector.extract_strided_slice %148 {offsets = [0, 256], sizes = [8, 128], strides = [1, 1]} : vector<8x384xf32> to vector<8x128xf32>
    %152 = vector.extract_strided_slice %142 {offsets = [0, 384], sizes = [8, 128], strides = [1, 1]} : vector<8x512xf32> to vector<8x128xf32>
    %153 = math.tanh %152 : vector<8x128xf32>
    %154 = arith.mulf %150, %135 : vector<8x128xf32>
    %155 = arith.mulf %149, %153 : vector<8x128xf32>
    %156 = arith.addf %154, %155 : vector<8x128xf32>
    %157 = math.tanh %156 : vector<8x128xf32>
    %158 = arith.mulf %151, %157 : vector<8x128xf32>
    %c56 = arith.constant 56 : index
    %c0_45 = arith.constant 0 : index
    %159 = vector.load %arg4[%c56, %c0_45] : memref<64x512xf32, #tpu.memory_space<vmem>>, vector<8x512xf32>
    %160 = arith.truncf %158 : vector<8x128xf32> to vector<8x128xbf16>
    %c0_46 = arith.constant 0 : index
    %c0_47 = arith.constant 0 : index
    %161 = vector.load %arg1[%c0_46, %c0_47] : memref<128x512xbf16, #tpu.memory_space<vmem>>, vector<128x512xbf16>
    %cst_48 = arith.constant dense<0.000000e+00> : vector<8x512xf32>
    %162 = tpu.matmul %160, %161, %cst_48 {dimension_numbers = #tpu.dot_dimension_numbers<[1], [0], [0], [1], [0, 0, 1, 1], [], []>} : vector<8x128xbf16>, vector<128x512xbf16>, vector<8x512xf32> -> vector<8x512xf32>
    %163 = arith.addf %159, %162 : vector<8x512xf32>
    %164 = vector.extract_strided_slice %163 {offsets = [0, 0], sizes = [8, 384], strides = [1, 1]} : vector<8x512xf32> to vector<8x384xf32>
    %165 = arith.negf %164 : vector<8x384xf32>
    %166 = math.exp %165 : vector<8x384xf32>
    %cst_49 = arith.constant 1.000000e+00 : f32
    %167 = vector.broadcast %cst_49 : f32 to vector<8x384xf32>
    %168 = arith.addf %167, %166 : vector<8x384xf32>
    %169 = arith.divf %167, %168 : vector<8x384xf32>
    %170 = vector.extract_strided_slice %169 {offsets = [0, 0], sizes = [8, 128], strides = [1, 1]} : vector<8x384xf32> to vector<8x128xf32>
    %171 = vector.extract_strided_slice %169 {offsets = [0, 128], sizes = [8, 128], strides = [1, 1]} : vector<8x384xf32> to vector<8x128xf32>
    %172 = vector.extract_strided_slice %169 {offsets = [0, 256], sizes = [8, 128], strides = [1, 1]} : vector<8x384xf32> to vector<8x128xf32>
    %173 = vector.extract_strided_slice %163 {offsets = [0, 384], sizes = [8, 128], strides = [1, 1]} : vector<8x512xf32> to vector<8x128xf32>
    %174 = math.tanh %173 : vector<8x128xf32>
    %175 = arith.mulf %171, %156 : vector<8x128xf32>
    %176 = arith.mulf %170, %174 : vector<8x128xf32>
    %177 = arith.addf %175, %176 : vector<8x128xf32>
    %178 = math.tanh %177 : vector<8x128xf32>
    %179 = arith.mulf %172, %178 : vector<8x128xf32>
    %c0_50 = arith.constant 0 : index
    %c0_51 = arith.constant 0 : index
    %180 = vector.load %arg2[%c0_50, %c0_51] : memref<144x512xf32, #tpu.memory_space<vmem>>, vector<8x512xf32>
    %181 = vector.extract_strided_slice %180 {offsets = [1, 0], sizes = [1, 128], strides = [1, 1]} : vector<8x512xf32> to vector<1x128xf32>
    %182 = vector.extract_strided_slice %180 {offsets = [1, 128], sizes = [1, 128], strides = [1, 1]} : vector<8x512xf32> to vector<1x128xf32>
    %c16_52 = arith.constant 16 : index
    %c0_53 = arith.constant 0 : index
    %183 = vector.load %arg2[%c16_52, %c0_53] : memref<144x512xf32, #tpu.memory_space<vmem>>, vector<128x128xf32>
    %184 = arith.truncf %183 : vector<128x128xf32> to vector<128x128xbf16>
    %c16_54 = arith.constant 16 : index
    %c128 = arith.constant 128 : index
    %185 = vector.load %arg2[%c16_54, %c128] : memref<144x512xf32, #tpu.memory_space<vmem>>, vector<128x128xf32>
    %186 = arith.truncf %185 : vector<128x128xf32> to vector<128x128xbf16>
    %187 = arith.truncf %179 : vector<8x128xf32> to vector<8x128xbf16>
    %cst_55 = arith.constant dense<0.000000e+00> : vector<8x128xf32>
    %188 = tpu.matmul %187, %184, %cst_55 {dimension_numbers = #tpu.dot_dimension_numbers<[1], [0], [0], [1], [0, 0, 1, 1], [], []>} : vector<8x128xbf16>, vector<128x128xbf16>, vector<8x128xf32> -> vector<8x128xf32>
    %189 = vector.broadcast %181 : vector<1x128xf32> to vector<8x128xf32>
    %190 = arith.addf %188, %189 : vector<8x128xf32>
    %191 = math.tanh %190 : vector<8x128xf32>
    %192 = arith.truncf %191 : vector<8x128xf32> to vector<8x128xbf16>
    %cst_56 = arith.constant dense<0.000000e+00> : vector<8x128xf32>
    %193 = tpu.matmul %192, %186, %cst_56 {dimension_numbers = #tpu.dot_dimension_numbers<[1], [0], [0], [1], [0, 0, 1, 1], [], []>} : vector<8x128xbf16>, vector<128x128xbf16>, vector<8x128xf32> -> vector<8x128xf32>
    %194 = vector.broadcast %182 : vector<1x128xf32> to vector<8x128xf32>
    %195 = arith.addf %193, %194 : vector<8x128xf32>
    %c0_57 = arith.constant 0 : index
    %c0_58 = arith.constant 0 : index
    %196 = vector.load %arg3[%c0_57, %c0_58] : memref<8x128xf32, #tpu.memory_space<vmem>>, vector<8x128xf32>
    tpu.vector_store %arg3[%c0_57, %c0_58], %195 {strides = array<i32>} : memref<8x128xf32, #tpu.memory_space<vmem>>, vector<8x128xf32>,
    return
  }
}

</mosaic_0001>

<bundles_post_ra>
// kernel: tpu_custom_call.1
= control target key start
LH: loop header
LB: loop body
LE: loop exit
PB: predicated region body
PF: predicated region fallthrough
CT: control target
= control target key end

     0   :  { %8 = vsyncpa [#allocation4], 0  ;;  %s2615_s0 = inlined_call_operand.vmem [shape: f32[64,8], index: 0, kind: input, shape index: {}]   ;;  %s2616_s1 = inlined_call_operand.hbm [shape: bf16[128,512], index: 1, kind: input, shape index: {}]   ;;  %s2617_s2 = inlined_call_operand.hbm [shape: f32[144,512], index: 2, kind: input, shape index: {}]   ;;  %s2618_s3 = inlined_call_operand.hbm [shape: f32[8,128], index: 3, kind: output, shape index: {}]  }
   0x1   :  { %9 = vsyncpa [#allocation7], 0 }
   0x2   :  { %10 = vsyncpa [#allocation5], 0  ;;  %s1973_s12 = smov [#allocation3]   ;;  %s1901_s16 = scalar_lea.hbm %s2616_s1, 4096 }
   0x3   :  { %s18_s13 = sshll.u32 %s1973_s12, 4  ;;  %p1902_p0 = scmp.ne.s32.totalorder %s2616_s1, %s1901_s16  ;;  %s19_s13 = int_to_ptr.vmem [resolvable:$true] %s18_s13 }
   0x4   :  { %p1905_p1 = scmp.lt.u32.totalorder %s1901_s16, %s2616_s1 }
   0x6   :  { %p1907_p2 = pnand %p1905_p1, %p1902_p0 }
   0x8   :  { %1910 = shalt.err (!%p1907_p2)
}
   0x9   :  { %s1911_s21 = scalar_lea.vmem %s19_s13, 4096  ;;  %p1916_p4 = scmp.lt.s32.totalorder %s19_s13, %s19_s13 }
   0xa   :  { %p1912_p3 = scmp.ne.s32.totalorder %s19_s13, %s1911_s21  ;;  %p1917_p5 = scmp.lt.s32.totalorder %s1911_s21, %s1911_s21 }
   0xc   :  { %p1918_p6 = por %p1917_p5, %p1916_p4 }
   0xe   :  { %p1919_p7 = pnand %p1918_p6, %p1912_p3 }
  0x10   :  { %1922 = shalt.err (!%p1919_p7)
}
  0x11   :  { %s1974_s22 = smov 256   ;;  %s1975_s23 = smov 16  }
  0x12   :  { %24 = dma.hbm_to_vmem [thread:$0]  %s2616_s1, 4096, %s19_s13, [#allocation4], %s1974_s22, %s1974_s22, %s1975_s23  }
  0x13   :  { %s1976_s26 = smov [#allocation6]   ;;  %s1923_s30 = scalar_lea.hbm %s2617_s2, 9216 }
  0x14   :  { %s30_s27 = sshll.u32 %s1976_s26, 4  ;;  %p1924_p8 = scmp.ne.s32.totalorder %s2617_s2, %s1923_s30  ;;  %s31_s27 = int_to_ptr.vmem [resolvable:$true] %s30_s27 }
  0x15   :  { %p1927_p9 = scmp.lt.u32.totalorder %s1923_s30, %s2617_s2 }
  0x17   :  { %p1929_p10 = pnand %p1927_p9, %p1924_p8 }
  0x19   :  { %1932 = shalt.err (!%p1929_p10)
}
  0x1a   :  { %s1933_s8 = scalar_lea.vmem %s31_s27, 9216  ;;  %p1938_p12 = scmp.lt.s32.totalorder %s31_s27, %s31_s27 }
  0x1b   :  { %p1934_p11 = scmp.ne.s32.totalorder %s31_s27, %s1933_s8  ;;  %p1939_p13 = scmp.lt.s32.totalorder %s1933_s8, %s1933_s8 }
  0x1d   :  { %p1940_p0 = por %p1939_p13, %p1938_p12 }
  0x1f   :  { %p1941_p1 = pnand %p1940_p0, %p1934_p11 }
  0x21   :  { %1944 = shalt.err (!%p1941_p1)
}
  0x22   :  { %s1977_s1 = smov 512   ;;  %s1978_s9 = smov 32  }
  0x23   :  { %36 = dma.hbm_to_vmem [thread:$0]  %s2617_s2, 9216, %s31_s27, [#allocation7], %s1977_s1, %s1977_s1, %s1978_s9  }
  0x24   :  { %1967 = dma.done.wait [#allocation4], 4096  }
  0x25   :  { %1968 = vsyncadd [#allocation4], 4294963200 }
  0x26   :  { %1969 = dma.done.wait [#allocation7], 9216  }
  0x27   :  { %1970 = vsyncadd [#allocation7], 4294958080  ;;  %v2619_v0 = vmov 0   ;;  %v45_v1 = vld [vmem:[#allocation6 + $0x28] sm:$0xff]  ;;  %vm97_vm0 = vcmask 1043456   ;;  %v47_v2 = vld [vmem:[#allocation6 + $0x38] sm:$0xff]  ;;  %v68_v55 = vlaneseq }
  0x28   :  { %142 = vmatprep.mubr.bf16.mxu0 %v2619_v0  ;;  %215 = vmatprep.mubr.bf16.mxu1 %v2619_v0  ;;  %v44_v3 = vld [vmem:[#allocation6 + $0x20] sm:$0xff]  ;;  %v49_v4 = vpack.c.bf16 %v45_v1, %v45_v1  ;;  %v51_v5 = vpack.c.bf16 %v47_v2, %v47_v2  ;;  %v46_v7 = vld [vmem:[#allocation6 + $0x30] sm:$0xff]  ;;  %v57_v9 = vld [vmem:[%s2615_s0 + $0x8] sm:$0xff]  ;;  %vm84_vm1 = vcmask 64512   ;;  %vm1981_vm2 = vmmov 0  }
  0x29   :  { %v48_v6 = vpack.c.bf16 %v44_v3, %v44_v3  ;;  %v56_v8 = vld [vmem:[%s2615_s0] sm:$0xff]  ;;  %v50_v10 = vpack.c.bf16 %v46_v7, %v46_v7  ;;  %v2040_v14 = vld [vmem:[#allocation3 + $0xc] ss:$16 sps:$4 sm:$0xff]   ;;  %v2045_v17 = vld [vmem:[#allocation3 + $0x8] ss:$16 sps:$4 sm:$0xff]   ;;  %v2207_v56 = vshrl.u32 %v68_v55, 7 }
  0x2a   :  { %v2035_v11 = vld [vmem:[#allocation3 + $0x4] ss:$16 sps:$4 sm:$0xff]   ;;  %1557 = vmatprep.subr.msk.bf16.mxu0 %vm97_vm0, %v49_v4  ;;  %1562 = vmatprep.subr.msk.bf16.mxu1 %vm97_vm0, %v51_v5  ;;  %v64_v13 = vpack.c.bf16 %v57_v9, %v56_v8  ;;  %v2043_v16 = vld [vmem:[#allocation3] ss:$16 sps:$4 sm:$0xff]   ;;  %v2051_v19 = vld [vmem:[#allocation3 + $0x2c] ss:$16 sps:$4 sm:$0xff]  }
  0x2b   :  { %v99_v12 = vsel %vm97_vm0, %v48_v6, 0  ;;  %v105_v15 = vsel %vm97_vm0, %v50_v10, 0  ;;  %v2048_v18 = vld [vmem:[#allocation3 + $0x24] ss:$16 sps:$4 sm:$0xff]   ;;  %v2054_v20 = vld [vmem:[#allocation3 + $0x20] ss:$16 sps:$4 sm:$0xff]  }
  0x2c   :  { %111 = vmatpush1.bf16.msra.mxu0 %v99_v12  ;;  %184 = vmatpush1.bf16.msra.mxu1 %v105_v15  ;;  %v2056_v21 = vld [vmem:[#allocation3 + $0x28] ss:$16 sps:$4 sm:$0xff]   ;;  %v58_v22 = vld [vmem:[%s2615_s0 + $0x10] sm:$0xff]  ;;  %v2072_v25 = vld [vmem:[#allocation3 + $0x4c] ss:$16 sps:$4 sm:$0xff]   ;;  %2622 = vst [vmem:[#allocation12_spill] sm:$0xff] %v2207_v56 }
  0x2d   :  { %484 = vmatprep.subr.bf16.mxu0 %v2035_v11  ;;  %525 = vmatprep.subr.bf16.mxu1 %v2040_v14  ;;  %v59_v23 = vld [vmem:[%s2615_s0 + $0x18] sm:$0xff]  ;;  %v2068_v24 = vld [vmem:[#allocation3 + $0x44] ss:$16 sps:$4 sm:$0xff]   ;;  %v2076_v27 = vld [vmem:[#allocation3 + $0x40] ss:$16 sps:$4 sm:$0xff]   ;;  %v70_v57 = vsub.s32 0, %v2207_v56 }
  0x2e   :  { %v65_v26 = vpack.c.bf16 %v59_v23, %v58_v22  ;;  %v2080_v28 = vld [vmem:[#allocation3 + $0x48] ss:$16 sps:$4 sm:$0xff]   ;;  %v2082_v29 = vld [vmem:[#allocation3 + $0x64] ss:$16 sps:$4 sm:$0xff]   ;;  %v2084_v30 = vld [vmem:[#allocation3 + $0x6c] ss:$16 sps:$4 sm:$0xff]  }
  0x2f   :  { %1558 = vmatmul.mubr.msk.bf16.vlgmr.msra.gmra.mrb[0].mxu0 %vm84_vm1, %v64_v13  ;;  %1563 = vmatmul.mubr.msk.bf16.vlgmr.msra.gmra.mrb[0].mxu1 %vm84_vm1, %v64_v13  ;;  %v2087_v31 = vld [vmem:[#allocation3 + $0x60] ss:$16 sps:$4 sm:$0xff]   ;;  %v2090_v32 = vld [vmem:[#allocation3 + $0x68] ss:$16 sps:$4 sm:$0xff]   ;;  %v2102_v35 = vld [vmem:[#allocation3 + $0x84] ss:$16 sps:$4 sm:$0xff]  }
  0x30   :  { %485 = vmatpush1.bf16.msra.mxu0 %v2043_v16  ;;  %526 = vmatpush1.bf16.msra.mxu1 %v2045_v17  ;;  %v60_v33 = vld [vmem:[%s2615_s0 + $0x20] sm:$0xff]  ;;  %v61_v34 = vld [vmem:[%s2615_s0 + $0x28] sm:$0xff]  ;;  %v62_v43 = vld [vmem:[%s2615_s0 + $0x30] sm:$0xff] }
  0x31   :  { %486 = vmatprep.subr.bf16.mxu0 %v2048_v18  ;;  %527 = vmatprep.subr.bf16.mxu1 %v2051_v19  ;;  %v2106_v36 = vld [vmem:[#allocation3 + $0x8c] ss:$16 sps:$4 sm:$0xff]   ;;  %v66_v37 = vpack.c.bf16 %v61_v34, %v60_v33  ;;  %v2109_v38 = vld [vmem:[#allocation3 + $0x80] ss:$16 sps:$4 sm:$0xff]   ;;  %v2112_v39 = vld [vmem:[#allocation3 + $0x88] ss:$16 sps:$4 sm:$0xff]  }
  0x32   :  { %152 = vmatprep.mubr.bf16.mxu0 %v2619_v0  ;;  %225 = vmatprep.mubr.bf16.mxu1 %v2619_v0  ;;  %v2116_v40 = vld [vmem:[#allocation3 + $0xa4] ss:$16 sps:$4 sm:$0xff]   ;;  %v2119_v41 = vld [vmem:[#allocation3 + $0xac] ss:$16 sps:$4 sm:$0xff]   ;;  %v2122_v42 = vld [vmem:[#allocation3 + $0xa0] ss:$16 sps:$4 sm:$0xff]  }
  0x33   :  { %v63_v44 = vld [vmem:[%s2615_s0 + $0x38] sm:$0xff]  ;;  %v2136_v46 = vld [vmem:[#allocation3 + $0xc4] ss:$16 sps:$4 sm:$0xff]   ;;  %v2144_v49 = vld [vmem:[#allocation3 + $0xc0] ss:$16 sps:$4 sm:$0xff]   ;;  %s1982_s0 = smov [#allocation8]  }
  0x34   :  { %487 = vmatpush1.bf16.msra.mxu0 %v2054_v20  ;;  %528 = vmatpush1.bf16.msra.mxu1 %v2056_v21  ;;  %v2134_v45 = vld [vmem:[#allocation3 + $0xa8] ss:$16 sps:$4 sm:$0xff]   ;;  %v2140_v47 = vld [vmem:[#allocation3 + $0xcc] ss:$16 sps:$4 sm:$0xff]   ;;  %v67_v48 = vpack.c.bf16 %v63_v44, %v62_v43  ;;  %v2150_v51 = vld [vmem:[#allocation3 + $0xe4] ss:$16 sps:$4 sm:$0xff]  }
  0x35   :  { %488 = vmatprep.subr.bf16.mxu0 %v2068_v24  ;;  %529 = vmatprep.subr.bf16.mxu1 %v2072_v25  ;;  %v2148_v50 = vld [vmem:[#allocation3 + $0xc8] ss:$16 sps:$4 sm:$0xff]   ;;  %v2153_v52 = vld [vmem:[#allocation3 + $0xec] ss:$16 sps:$4 sm:$0xff]   ;;  %v2158_v53 = vld [vmem:[#allocation3 + $0xe0] ss:$16 sps:$4 sm:$0xff]  }
  0x36   :  { %v2162_v54 = vld [vmem:[#allocation3 + $0xe8] ss:$16 sps:$4 sm:$0xff]   ;;  %v54_v58 = vld [vmem:[#allocation6 + $0x10] sm:$0xff]  ;;  %v52_v59 = vld [vmem:[#allocation6] sm:$0xff]  ;;  %s1547_s27 = sshll.u32 %s1982_s0, 4  ;;  %s1548_s27 = int_to_ptr.vmem [resolvable:$true] %s1547_s27 }
  0x37   :  { %1559 = vmatmul.mubr.msk.bf16.gmra.mrb[4].mxu0 %vm84_vm1, %v65_v26  ;;  %1564 = vmatmul.mubr.msk.bf16.gmra.mrb[4].mxu1 %vm84_vm1, %v65_v26  ;;  %v55_v60 = vld [vmem:[#allocation6 + $0x18] sm:$0xff]  ;;  %v53_v61 = vld [vmem:[#allocation6 + $0x8] sm:$0xff]  ;;  %v2212_v63 = vrot.slane %v54_v58, %v70_v57  ;;  %v71_v1 = vrot.slane %v52_v59, %v70_v57  ;;  %s1945_s28 = scalar_lea.vmem %s1548_s27, 128  ;;  %p1950_p3 = scmp.lt.s32.totalorder %s1548_s27, %s1548_s27 }
  0x38   :  { %489 = vmatpush1.bf16.msra.mxu0 %v2076_v27  ;;  %530 = vmatpush1.bf16.msra.mxu1 %v2080_v28  ;;  %v2214_v4 = vrot.slane %v55_v60, %v70_v57  ;;  %v75_v5 = vrot.slane %v53_v61, %v70_v57  ;;  %p1946_p2 = scmp.ne.s32.totalorder %s1548_s27, %s1945_s28  ;;  %p1951_p4 = scmp.lt.s32.totalorder %s1945_s28, %s1945_s28 }
  0x39   :  { %490 = vmatprep.subr.bf16.mxu0 %v2082_v29  ;;  %531 = vmatprep.subr.bf16.mxu1 %v2084_v30 }
  0x3a   :  { %162 = vmatprep.mubr.bf16.mxu0 %v2619_v0  ;;  %235 = vmatprep.mubr.bf16.mxu1 %v2619_v0  ;;  %p1952_p5 = por %p1951_p4, %p1950_p3 }
  0x3c   :  { %491 = vmatpush1.bf16.msra.mxu0 %v2087_v31  ;;  %532 = vmatpush1.bf16.msra.mxu1 %v2090_v32  ;;  %p1953_p6 = pnand %p1952_p5, %p1946_p2 }
  0x3d   :  { %492 = vmatprep.subr.bf16.mxu0 %v2102_v35  ;;  %533 = vmatprep.subr.bf16.mxu1 %v2106_v36 }
  0x3f   :  { %1560 = vmatmul.mubr.msk.bf16.gmra.mrb[8].mxu0 %vm84_vm1, %v66_v37  ;;  %1565 = vmatmul.mubr.msk.bf16.gmra.mrb[8].mxu1 %vm84_vm1, %v66_v37 }
  0x40   :  { %493 = vmatpush1.bf16.msra.mxu0 %v2109_v38  ;;  %534 = vmatpush1.bf16.msra.mxu1 %v2112_v39 }
  0x41   :  { %494 = vmatprep.subr.bf16.mxu0 %v2116_v40  ;;  %535 = vmatprep.subr.bf16.mxu1 %v2119_v41 }
  0x42   :  { %172 = vmatprep.mubr.bf16.mxu0 %v2619_v0  ;;  %245 = vmatprep.mubr.bf16.mxu1 %v2619_v0 }
  0x44   :  { %495 = vmatpush1.bf16.msra.mxu0 %v2122_v42  ;;  %536 = vmatpush1.bf16.msra.mxu1 %v2134_v45 }
  0x45   :  { %496 = vmatprep.subr.bf16.mxu0 %v2136_v46  ;;  %537 = vmatprep.subr.bf16.mxu1 %v2140_v47 }
  0x47   :  { %1561 = vmatmul.mubr.msk.bf16.gmra.mrb[12].mxu0 %vm84_vm1, %v67_v48  ;;  %1566 = vmatmul.mubr.msk.bf16.gmra.mrb[12].mxu1 %vm84_vm1, %v67_v48 }
  0x48   :  { %497 = vmatpush1.bf16.msra.mxu0 %v2144_v49  ;;  %538 = vmatpush1.bf16.msra.mxu1 %v2148_v50 }
  0x49   :  { %498 = vmatprep.subr.bf16.mxu0 %v2150_v51  ;;  %539 = vmatprep.subr.bf16.mxu1 %v2153_v52 }
  0x4a   :  { %516 = vmatprep.mubr.bf16.mxu0 %v2619_v0  ;;  %557 = vmatprep.mubr.bf16.mxu1 %v2619_v0 }
  0x4c   :  { %499 = vmatpush1.bf16.msra.mxu0 %v2158_v53  ;;  %540 = vmatpush1.bf16.msra.mxu1 %v2162_v54 }
  0x4d   :  { %599 = vmatprep.subr.bf16.mxu0 %v2035_v11  ;;  %640 = vmatprep.subr.bf16.mxu1 %v2040_v14 }
  0x4f   :  { %517 = vmatmul.mubr.bf16.vlgmr.msra.gmra.mrb[16].mxu0 %v2619_v0  ;;  %558 = vmatmul.mubr.bf16.vlgmr.msra.gmra.mrb[16].mxu1 %v2619_v0 }
  0x50   :  { %600 = vmatpush1.bf16.msra.mxu0 %v2043_v16  ;;  %641 = vmatpush1.bf16.msra.mxu1 %v2045_v17 }
  0x51   :  { %601 = vmatprep.subr.bf16.mxu0 %v2048_v18  ;;  %642 = vmatprep.subr.bf16.mxu1 %v2051_v19 }
  0x52   :  { %631 = vmatprep.mubr.bf16.mxu0 %v2619_v0  ;;  %672 = vmatprep.mubr.bf16.mxu1 %v2619_v0 }
  0x54   :  { %602 = vmatpush1.bf16.msra.mxu0 %v2054_v20  ;;  %643 = vmatpush1.bf16.msra.mxu1 %v2056_v21 }
  0x55   :  { %603 = vmatprep.subr.bf16.mxu0 %v2068_v24  ;;  %644 = vmatprep.subr.bf16.mxu1 %v2072_v25 }
  0x58   :  { %604 = vmatpush1.bf16.msra.mxu0 %v2076_v27  ;;  %645 = vmatpush1.bf16.msra.mxu1 %v2080_v28 }
  0x59   :  { %605 = vmatprep.subr.bf16.mxu0 %v2082_v29  ;;  %646 = vmatprep.subr.bf16.mxu1 %v2084_v30 }
  0x5c   :  { %606 = vmatpush1.bf16.msra.mxu0 %v2087_v31  ;;  %647 = vmatpush1.bf16.msra.mxu1 %v2090_v32 }
  0x5d   :  { %607 = vmatprep.subr.bf16.mxu0 %v2102_v35  ;;  %648 = vmatprep.subr.bf16.mxu1 %v2106_v36 }
  0x60   :  { %608 = vmatpush1.bf16.msra.mxu0 %v2109_v38  ;;  %649 = vmatpush1.bf16.msra.mxu1 %v2112_v39 }
  0x61   :  { %609 = vmatprep.subr.bf16.mxu0 %v2116_v40  ;;  %650 = vmatprep.subr.bf16.mxu1 %v2119_v41 }
  0x64   :  { %610 = vmatpush1.bf16.msra.mxu0 %v2122_v42  ;;  %651 = vmatpush1.bf16.msra.mxu1 %v2134_v45 }
  0x65   :  { %611 = vmatprep.subr.bf16.mxu0 %v2136_v46  ;;  %652 = vmatprep.subr.bf16.mxu1 %v2140_v47 }
  0x68   :  { %612 = vmatpush1.bf16.msra.mxu0 %v2144_v49  ;;  %653 = vmatpush1.bf16.msra.mxu1 %v2148_v50 }
  0x69   :  { %613 = vmatprep.subr.bf16.mxu0 %v2150_v51  ;;  %654 = vmatprep.subr.bf16.mxu1 %v2153_v52 }
  0x6c   :  { %614 = vmatpush1.bf16.msra.mxu0 %v2158_v53  ;;  %655 = vmatpush1.bf16.msra.mxu1 %v2162_v54 }
  0x6d   :  { %714 = vmatprep.subr.bf16.mxu0 %v2035_v11  ;;  %755 = vmatprep.subr.bf16.mxu1 %v2040_v14 }
 0x102   :  { %v2210_v62 = vpop.f32.mrb[0].mxu0  ;;  %v217_v3 = vpop.f32.mrb[0].mxu1 }
 0x103   :  { %v146_v2 = vpop.f32.mrb[1].mxu0  ;;  %v219_v7 = vpop.f32.mrb[1].mxu1 }
 0x104   :  { %v148_v6 = vpop.f32.mrb[2].mxu0  ;;  %v221_v10 = vpop.f32.mrb[2].mxu1 }
 0x105   :  { %v2216_v8 = vadd.f32 %v148_v6, %v71_v1  ;;  %v150_v9 = vpop.f32.mrb[3].mxu0  ;;  %v2221_v13 = vadd.f32 %v221_v10, %v2212_v63  ;;  %v223_v15 = vpop.f32.mrb[3].mxu1 }
 0x106   :  { %v2218_v12 = vadd.f32 %v150_v9, %v75_v5  ;;  %v2224_v22 = vadd.f32 %v223_v15, %v2214_v4 }
 0x10a   :  { %v154_v23 = vpop.f32.mrb[4].mxu0  ;;  %v227_v34 = vpop.f32.mrb[4].mxu1 }
 0x10b   :  { %v2226_v26 = vadd.f32 %v154_v23, %v71_v1  ;;  %v156_v33 = vpop.f32.mrb[5].mxu0  ;;  %v2231_v44 = vadd.f32 %v227_v34, %v2212_v63  ;;  %v229_v48 = vpop.f32.mrb[5].mxu1 }
 0x10c   :  { %v2228_v37 = vadd.f32 %v156_v33, %v75_v5  ;;  %v158_v43 = vpop.f32.mrb[6].mxu0  ;;  %v2236_v58 = vadd.f32 %v229_v48, %v2214_v4  ;;  %v231_v59 = vpop.f32.mrb[6].mxu1 }
 0x10d   :  { %v2233_v55 = vadd.f32 %v158_v43, %v71_v1  ;;  %v160_v57 = vpop.f32.mrb[7].mxu0  ;;  %v2241_v61 = vadd.f32 %v231_v59, %v2212_v63  ;;  %v233_v6 = vpop.f32.mrb[7].mxu1 }
 0x10e   :  { %2623 = vst [vmem:[#allocation13_spill] sm:$0xff] %v2228_v37  ;;  %2625 = vst [vmem:[#allocation15_spill] sm:$0xff] %v2236_v58  ;;  %v2238_v60 = vadd.f32 %v160_v57, %v75_v5  ;;  %v2244_v9 = vadd.f32 %v233_v6, %v2214_v4 }
 0x10f   :  { %2624 = vst [vmem:[#allocation14_spill] sm:$0xff] %v2233_v55  ;;  %2627 = vst [vmem:[#allocation17_spill] sm:$0xff] %v2241_v61 }
 0x110   :  { %2626 = vst [vmem:[#allocation16_spill] sm:$0xff] %v2238_v60  ;;  %2628 = vst [vmem:[#allocation18_spill] sm:$0xff] %v2244_v9 }
 0x112   :  { %v164_v10 = vpop.f32.mrb[8].mxu0  ;;  %v237_v33 = vpop.f32.mrb[8].mxu1 }
 0x113   :  { %v2246_v15 = vadd.f32 %v164_v10, %v71_v1  ;;  %v166_v23 = vpop.f32.mrb[9].mxu0  ;;  %v2251_v48 = vadd.f32 %v237_v33, %v2212_v63  ;;  %v239_v57 = vpop.f32.mrb[9].mxu1 }
 0x114   :  { %v2248_v34 = vadd.f32 %v166_v23, %v75_v5  ;;  %v168_v43 = vpop.f32.mrb[10].mxu0  ;;  %v2256_v56 = vadd.f32 %v239_v57, %v2214_v4  ;;  %v241_v6 = vpop.f32.mrb[10].mxu1 }
 0x115   :  { %2629 = vst [vmem:[#allocation19_spill] sm:$0xff] %v2246_v15  ;;  %2631 = vst [vmem:[#allocation21_spill] sm:$0xff] %v2251_v48  ;;  %v2253_v0 = vadd.f32 %v168_v43, %v71_v1  ;;  %v170_v59 = vpop.f32.mrb[11].mxu0  ;;  %v2261_v10 = vadd.f32 %v241_v6, %v2212_v63  ;;  %v243_v15 = vpop.f32.mrb[11].mxu1 }
 0x116   :  { %2630 = vst [vmem:[#allocation20_spill] sm:$0xff] %v2248_v34  ;;  %2633 = vst [vmem:[#allocation23_spill] sm:$0xff] %v2256_v56  ;;  %v2258_v9 = vadd.f32 %v170_v59, %v75_v5  ;;  %v2264_v23 = vadd.f32 %v243_v15, %v2214_v4 }
 0x117   :  { %2632 = vst [vmem:[#allocation22_spill] sm:$0xff] %v2253_v0  ;;  %2635 = vst [vmem:[#allocation25_spill] sm:$0xff] %v2261_v10 }
 0x118   :  { %2634 = vst [vmem:[#allocation24_spill] sm:$0xff] %v2258_v9  ;;  %2636 = vst [vmem:[#allocation26_spill] sm:$0xff] %v2264_v23 }
 0x11a   :  { %v174_v34 = vpop.f32.mrb[12].mxu0  ;;  %v247_v43 = vpop.f32.mrb[12].mxu1 }
 0x11b   :  { %v2266_v33 = vadd.f32 %v174_v34, %v71_v1  ;;  %v176_v48 = vpop.f32.mrb[13].mxu0  ;;  %v2271_v57 = vadd.f32 %v247_v43, %v2212_v63  ;;  %v249_v59 = vpop.f32.mrb[13].mxu1  ;;  %v145_v43 = vadd.f32 %v2210_v62, %v71_v1 }
 0x11c   :  { %v2268_v0 = vadd.f32 %v176_v48, %v75_v5  ;;  %v178_v60 = vpop.f32.mrb[14].mxu0  ;;  %v2276_v10 = vadd.f32 %v249_v59, %v2214_v4  ;;  %v251_v15 = vpop.f32.mrb[14].mxu1 }
 0x11d   :  { %2637 = vst [vmem:[#allocation27_spill] sm:$0xff] %v2266_v33  ;;  %2639 = vst [vmem:[#allocation29_spill] sm:$0xff] %v2271_v57  ;;  %v2273_v9 = vadd.f32 %v178_v60, %v71_v1  ;;  %v180_v6 = vpop.f32.mrb[15].mxu0  ;;  %v2281_v34 = vadd.f32 %v251_v15, %v2212_v63  ;;  %v253_v33 = vpop.f32.mrb[15].mxu1  ;;  %v218_v60 = vadd.f32 %v217_v3, %v2212_v63 }
 0x11e   :  { %2638 = vst [vmem:[#allocation28_spill] sm:$0xff] %v2268_v0  ;;  %2641 = vst [vmem:[#allocation31_spill] sm:$0xff] %v2276_v10  ;;  %v2278_v23 = vadd.f32 %v180_v6, %v75_v5  ;;  %v2284_v48 = vadd.f32 %v253_v33, %v2214_v4  ;;  %v147_v0 = vadd.f32 %v146_v2, %v75_v5 }
 0x11f   :  { %2640 = vst [vmem:[#allocation30_spill] sm:$0xff] %v2273_v9  ;;  %2643 = vst [vmem:[#allocation33_spill] sm:$0xff] %v2281_v34  ;;  %v220_v57 = vadd.f32 %v219_v7, %v2214_v4 }
 0x120   :  { %2642 = vst [vmem:[#allocation32_spill] sm:$0xff] %v2278_v23  ;;  %2644 = vst [vmem:[#allocation34_spill] sm:$0xff] %v2284_v48 }
 0x122   :  { %v518_v9 = vpop.f32.mrb[16].mxu0  ;;  %v559_v10 = vpop.f32.mrb[16].mxu1 }
 0x123   :  { %v566_v59 = vadd.f32 %v518_v9, %v145_v43  ;;  %v520_v56 = vpop.f32.mrb[17].mxu0  ;;  %v568_v6 = vadd.f32 %v559_v10, %v218_v60  ;;  %v561_v61 = vpop.f32.mrb[17].mxu1 }
 0x124   :  { %v567_v23 = vadd.f32 %v520_v56, %v147_v0  ;;  %v522_v15 = vpop.f32.mrb[18].mxu0  ;;  %v569_v55 = vadd.f32 %v561_v61, %v220_v57  ;;  %v563_v33 = vpop.f32.mrb[18].mxu1 }
 0x125   :  { %v1599_v34 = vmul.f32 -1.442695, %v566_v59  ;;  %v523_v58 = vpop.f32.mrb[19].mxu0  ;;  %v564_v37 = vpop.f32.mrb[19].mxu1  ;;  %v1601_v62 = vmul.f32 -1.442695, %v568_v6 }
 0x126   :  { %v1600_v48 = vmul.f32 -1.442695, %v567_v23 }
 0x127   :  { %1739 = vpow2.f32 %v1599_v34 }
 0x128   :  { %1741 = vpow2.f32 %v1600_v48 }
 0x129   :  { %1743 = vpow2.f32 %v1601_v62 }
 0x12a   :  { %1745 = vtanh.f32 %v569_v55  ;;  %v2645_v55 = vmov 0  }
 0x131   :  { %v1740_v63 = vpop.eup %1739 }
 0x132   :  { %v579_v1 = vadd.f32 1.0, %v1740_v63  ;;  %v1742_v2 = vpop.eup %1741 }
 0x133   :  { %v580_v3 = vadd.f32 1.0, %v1742_v2  ;;  %v1744_v0 = vpop.eup %1743 }
 0x134   :  { %1747 = vrcp.f32 %v579_v1  ;;  %v1746_v56 = vpop.eup %1745  ;;  %v581_v58 = vadd.f32 1.0, %v1744_v0 }
 0x135   :  { %1749 = vrcp.f32 %v580_v3 }
 0x136   :  { %1751 = vrcp.f32 %v581_v58 }
 0x13e   :  { %v1748_v4 = vpop.eup %1747 }
 0x13f   :  { %v590_v5 = vmul.f32 %v1748_v4, %v1746_v56  ;;  %v1750_v7 = vpop.eup %1749 }
 0x140   :  { %v589_v61 = vmul.f32 0.0, %v1750_v7  ;;  %v1752_v37 = vpop.eup %1751 }
 0x142   :  { %v2289_v9 = vadd.f32 %v590_v5, %v589_v61 }
 0x144   :  { %1753 = vtanh.f32 %v2289_v9 }
 0x14e   :  { %v1754_v10 = vpop.eup %1753 }
 0x14f   :  { %v593_v23 = vmul.f32 %v1754_v10, %v1752_v37 }
 0x151   :  { %v598_v57 = vpack.c.bf16 %v593_v23, %v593_v23 }
 0x153   :  { %632 = vmatmul.mubr.bf16.vlgmr.msra.gmra.mrb[20].mxu0 %v598_v57  ;;  %673 = vmatmul.mubr.bf16.vlgmr.msra.gmra.mrb[20].mxu1 %v598_v57 }
 0x154   :  { %715 = vmatpush1.bf16.msra.mxu0 %v2043_v16  ;;  %756 = vmatpush1.bf16.msra.mxu1 %v2045_v17 }
 0x155   :  { %716 = vmatprep.subr.bf16.mxu0 %v2048_v18  ;;  %757 = vmatprep.subr.bf16.mxu1 %v2051_v19 }
 0x156   :  { %746 = vmatprep.mubr.bf16.mxu0 %v2645_v55  ;;  %787 = vmatprep.mubr.bf16.mxu1 %v2645_v55 }
 0x158   :  { %717 = vmatpush1.bf16.msra.mxu0 %v2054_v20  ;;  %758 = vmatpush1.bf16.msra.mxu1 %v2056_v21 }
 0x159   :  { %718 = vmatprep.subr.bf16.mxu0 %v2068_v24  ;;  %759 = vmatprep.subr.bf16.mxu1 %v2072_v25 }
 0x15c   :  { %719 = vmatpush1.bf16.msra.mxu0 %v2076_v27  ;;  %760 = vmatpush1.bf16.msra.mxu1 %v2080_v28 }
 0x15d   :  { %720 = vmatprep.subr.bf16.mxu0 %v2082_v29  ;;  %761 = vmatprep.subr.bf16.mxu1 %v2084_v30 }
 0x160   :  { %721 = vmatpush1.bf16.msra.mxu0 %v2087_v31  ;;  %762 = vmatpush1.bf16.msra.mxu1 %v2090_v32 }
 0x161   :  { %722 = vmatprep.subr.bf16.mxu0 %v2102_v35  ;;  %763 = vmatprep.subr.bf16.mxu1 %v2106_v36 }
 0x164   :  { %723 = vmatpush1.bf16.msra.mxu0 %v2109_v38  ;;  %764 = vmatpush1.bf16.msra.mxu1 %v2112_v39 }
 0x165   :  { %724 = vmatprep.subr.bf16.mxu0 %v2116_v40  ;;  %765 = vmatprep.subr.bf16.mxu1 %v2119_v41 }
 0x168   :  { %725 = vmatpush1.bf16.msra.mxu0 %v2122_v42  ;;  %766 = vmatpush1.bf16.msra.mxu1 %v2134_v45 }
 0x169   :  { %726 = vmatprep.subr.bf16.mxu0 %v2136_v46  ;;  %767 = vmatprep.subr.bf16.mxu1 %v2140_v47 }
 0x16c   :  { %727 = vmatpush1.bf16.msra.mxu0 %v2144_v49  ;;  %768 = vmatpush1.bf16.msra.mxu1 %v2148_v50 }
 0x16d   :  { %728 = vmatprep.subr.bf16.mxu0 %v2150_v51  ;;  %769 = vmatprep.subr.bf16.mxu1 %v2153_v52 }
 0x170   :  { %729 = vmatpush1.bf16.msra.mxu0 %v2158_v53  ;;  %770 = vmatpush1.bf16.msra.mxu1 %v2162_v54 }
 0x171   :  { %829 = vmatprep.subr.bf16.mxu0 %v2035_v11  ;;  %870 = vmatprep.subr.bf16.mxu1 %v2040_v14 }
 0x226   :  { %v633_v34 = vpop.f32.mrb[20].mxu0  ;;  %v674_v48 = vpop.f32.mrb[20].mxu1 }
 0x227   :  { %v681_v43 = vadd.f32 %v633_v34, %v2216_v8  ;;  %v683_v60 = vadd.f32 %v674_v48, %v2221_v13  ;;  %v635_v59 = vpop.f32.mrb[21].mxu0  ;;  %v676_v6 = vpop.f32.mrb[21].mxu1 }
 0x228   :  { %v682_v15 = vadd.f32 %v635_v59, %v2218_v12  ;;  %v684_v33 = vadd.f32 %v676_v6, %v2224_v22  ;;  %v637_v62 = vpop.f32.mrb[22].mxu0  ;;  %v678_v63 = vpop.f32.mrb[22].mxu1 }
 0x229   :  { %v1602_v1 = vmul.f32 -1.442695, %v681_v43  ;;  %v638_v2 = vpop.f32.mrb[23].mxu0  ;;  %v679_v3 = vpop.f32.mrb[23].mxu1  ;;  %v1604_v56 = vmul.f32 -1.442695, %v683_v60 }
 0x22a   :  { %v1603_v0 = vmul.f32 -1.442695, %v682_v15  ;;  %v2646_v62 = vld [vmem:[#allocation13_spill] sm:$0xff] }
 0x22b   :  { %1755 = vpow2.f32 %v1602_v1  ;;  %v2647_v1 = vld [vmem:[#allocation15_spill] sm:$0xff] }
 0x22c   :  { %1757 = vpow2.f32 %v1603_v0 }
 0x22d   :  { %1759 = vtanh.f32 %v684_v33 }
 0x22e   :  { %1761 = vpow2.f32 %v1604_v56 }
 0x235   :  { %v1756_v4 = vpop.eup %1755 }
 0x236   :  { %v694_v5 = vadd.f32 1.0, %v1756_v4  ;;  %v1758_v8 = vpop.eup %1757 }
 0x237   :  { %v695_v13 = vadd.f32 1.0, %v1758_v8  ;;  %v1760_v12 = vpop.eup %1759 }
 0x238   :  { %1763 = vrcp.f32 %v694_v5  ;;  %v1762_v7 = vpop.eup %1761 }
 0x239   :  { %1765 = vrcp.f32 %v695_v13  ;;  %v696_v37 = vadd.f32 1.0, %v1762_v7 }
 0x23b   :  { %1767 = vrcp.f32 %v696_v37 }
 0x242   :  { %v1764_v22 = vpop.eup %1763 }
 0x243   :  { %v705_v58 = vmul.f32 %v1764_v22, %v1760_v12  ;;  %v1766_v61 = vpop.eup %1765 }
 0x244   :  { %v704_v10 = vmul.f32 %v1766_v61, %v2289_v9 }
 0x245   :  { %v1768_v57 = vpop.eup %1767 }
 0x246   :  { %v2331_v23 = vadd.f32 %v705_v58, %v704_v10 }
 0x248   :  { %1769 = vtanh.f32 %v2331_v23 }
 0x252   :  { %v1770_v34 = vpop.eup %1769 }
 0x253   :  { %v708_v48 = vmul.f32 %v1770_v34, %v1768_v57 }
 0x255   :  { %v713_v43 = vpack.c.bf16 %v708_v48, %v708_v48 }
 0x257   :  { %747 = vmatmul.mubr.bf16.vlgmr.msra.gmra.mrb[24].mxu0 %v713_v43  ;;  %788 = vmatmul.mubr.bf16.vlgmr.msra.gmra.mrb[24].mxu1 %v713_v43 }
 0x258   :  { %830 = vmatpush1.bf16.msra.mxu0 %v2043_v16  ;;  %871 = vmatpush1.bf16.msra.mxu1 %v2045_v17 }
 0x259   :  { %831 = vmatprep.subr.bf16.mxu0 %v2048_v18  ;;  %872 = vmatprep.subr.bf16.mxu1 %v2051_v19 }
 0x25a   :  { %861 = vmatprep.mubr.bf16.mxu0 %v2645_v55  ;;  %902 = vmatprep.mubr.bf16.mxu1 %v2645_v55 }
 0x25c   :  { %832 = vmatpush1.bf16.msra.mxu0 %v2054_v20  ;;  %873 = vmatpush1.bf16.msra.mxu1 %v2056_v21 }
 0x25d   :  { %833 = vmatprep.subr.bf16.mxu0 %v2068_v24  ;;  %874 = vmatprep.subr.bf16.mxu1 %v2072_v25 }
 0x260   :  { %834 = vmatpush1.bf16.msra.mxu0 %v2076_v27  ;;  %875 = vmatpush1.bf16.msra.mxu1 %v2080_v28 }
 0x261   :  { %835 = vmatprep.subr.bf16.mxu0 %v2082_v29  ;;  %876 = vmatprep.subr.bf16.mxu1 %v2084_v30 }
 0x264   :  { %836 = vmatpush1.bf16.msra.mxu0 %v2087_v31  ;;  %877 = vmatpush1.bf16.msra.mxu1 %v2090_v32 }
 0x265   :  { %837 = vmatprep.subr.bf16.mxu0 %v2102_v35  ;;  %878 = vmatprep.subr.bf16.mxu1 %v2106_v36 }
 0x268   :  { %838 = vmatpush1.bf16.msra.mxu0 %v2109_v38  ;;  %879 = vmatpush1.bf16.msra.mxu1 %v2112_v39 }
 0x269   :  { %839 = vmatprep.subr.bf16.mxu0 %v2116_v40  ;;  %880 = vmatprep.subr.bf16.mxu1 %v2119_v41 }
 0x26c   :  { %840 = vmatpush1.bf16.msra.mxu0 %v2122_v42  ;;  %881 = vmatpush1.bf16.msra.mxu1 %v2134_v45 }
 0x26d   :  { %841 = vmatprep.subr.bf16.mxu0 %v2136_v46  ;;  %882 = vmatprep.subr.bf16.mxu1 %v2140_v47 }
 0x270   :  { %842 = vmatpush1.bf16.msra.mxu0 %v2144_v49  ;;  %883 = vmatpush1.bf16.msra.mxu1 %v2148_v50 }
 0x271   :  { %843 = vmatprep.subr.bf16.mxu0 %v2150_v51  ;;  %884 = vmatprep.subr.bf16.mxu1 %v2153_v52 }
 0x274   :  { %844 = vmatpush1.bf16.msra.mxu0 %v2158_v53  ;;  %885 = vmatpush1.bf16.msra.mxu1 %v2162_v54 }
 0x275   :  { %944 = vmatprep.subr.bf16.mxu0 %v2035_v11  ;;  %985 = vmatprep.subr.bf16.mxu1 %v2040_v14 }
 0x32a   :  { %v748_v9 = vpop.f32.mrb[24].mxu0  ;;  %v789_v60 = vpop.f32.mrb[24].mxu1 }
 0x32b   :  { %v796_v59 = vadd.f32 %v748_v9, %v2226_v26  ;;  %v798_v6 = vadd.f32 %v789_v60, %v2231_v44  ;;  %v750_v15 = vpop.f32.mrb[25].mxu0  ;;  %v791_v33 = vpop.f32.mrb[25].mxu1 }
 0x32c   :  { %v797_v63 = vadd.f32 %v750_v15, %v2646_v62  ;;  %v799_v2 = vadd.f32 %v791_v33, %v2647_v1  ;;  %v752_v3 = vpop.f32.mrb[26].mxu0  ;;  %v793_v0 = vpop.f32.mrb[26].mxu1  ;;  %v2648_v15 = vld [vmem:[#allocation14_spill] sm:$0xff]  ;;  %v2649_v62 = vld [vmem:[#allocation17_spill] sm:$0xff] }
 0x32d   :  { %v1605_v56 = vmul.f32 -1.442695, %v796_v59  ;;  %v753_v4 = vpop.f32.mrb[27].mxu0  ;;  %v794_v5 = vpop.f32.mrb[27].mxu1  ;;  %v1607_v13 = vmul.f32 -1.442695, %v798_v6 }
 0x32e   :  { %v1606_v8 = vmul.f32 -1.442695, %v797_v63  ;;  %v2650_v3 = vld [vmem:[#allocation16_spill] sm:$0xff] }
 0x32f   :  { %1771 = vpow2.f32 %v1605_v56  ;;  %v2651_v56 = vld [vmem:[#allocation18_spill] sm:$0xff] }
 0x330   :  { %1773 = vpow2.f32 %v1606_v8 }
 0x331   :  { %1775 = vtanh.f32 %v799_v2 }
 0x332   :  { %1777 = vpow2.f32 %v1607_v13 }
 0x339   :  { %v1772_v12 = vpop.eup %1771 }
 0x33a   :  { %v809_v7 = vadd.f32 1.0, %v1772_v12  ;;  %v1774_v26 = vpop.eup %1773 }
 0x33b   :  { %v810_v44 = vadd.f32 1.0, %v1774_v26  ;;  %v1776_v22 = vpop.eup %1775 }
 0x33c   :  { %1779 = vrcp.f32 %v809_v7  ;;  %v1778_v58 = vpop.eup %1777 }
 0x33d   :  { %1781 = vrcp.f32 %v810_v44  ;;  %v811_v57 = vadd.f32 1.0, %v1778_v58 }
 0x33f   :  { %1783 = vrcp.f32 %v811_v57 }
 0x346   :  { %v1780_v61 = vpop.eup %1779 }
 0x347   :  { %v820_v37 = vmul.f32 %v1780_v61, %v1776_v22  ;;  %v1782_v10 = vpop.eup %1781 }
 0x348   :  { %v819_v34 = vmul.f32 %v1782_v10, %v2331_v23 }
 0x349   :  { %v1784_v43 = vpop.eup %1783 }
 0x34a   :  { %v2373_v48 = vadd.f32 %v820_v37, %v819_v34 }
 0x34c   :  { %1785 = vtanh.f32 %v2373_v48 }
 0x356   :  { %v1786_v9 = vpop.eup %1785 }
 0x357   :  { %v823_v60 = vmul.f32 %v1786_v9, %v1784_v43 }
 0x359   :  { %v828_v59 = vpack.c.bf16 %v823_v60, %v823_v60 }
 0x35b   :  { %862 = vmatmul.mubr.bf16.vlgmr.msra.gmra.mrb[28].mxu0 %v828_v59  ;;  %903 = vmatmul.mubr.bf16.vlgmr.msra.gmra.mrb[28].mxu1 %v828_v59 }
 0x35c   :  { %945 = vmatpush1.bf16.msra.mxu0 %v2043_v16  ;;  %986 = vmatpush1.bf16.msra.mxu1 %v2045_v17 }
 0x35d   :  { %946 = vmatprep.subr.bf16.mxu0 %v2048_v18  ;;  %987 = vmatprep.subr.bf16.mxu1 %v2051_v19 }
 0x35e   :  { %976 = vmatprep.mubr.bf16.mxu0 %v2645_v55  ;;  %1017 = vmatprep.mubr.bf16.mxu1 %v2645_v55 }
 0x360   :  { %947 = vmatpush1.bf16.msra.mxu0 %v2054_v20  ;;  %988 = vmatpush1.bf16.msra.mxu1 %v2056_v21 }
 0x361   :  { %948 = vmatprep.subr.bf16.mxu0 %v2068_v24  ;;  %989 = vmatprep.subr.bf16.mxu1 %v2072_v25 }
 0x364   :  { %949 = vmatpush1.bf16.msra.mxu0 %v2076_v27  ;;  %990 = vmatpush1.bf16.msra.mxu1 %v2080_v28 }
 0x365   :  { %950 = vmatprep.subr.bf16.mxu0 %v2082_v29  ;;  %991 = vmatprep.subr.bf16.mxu1 %v2084_v30 }
 0x368   :  { %951 = vmatpush1.bf16.msra.mxu0 %v2087_v31  ;;  %992 = vmatpush1.bf16.msra.mxu1 %v2090_v32 }
 0x369   :  { %952 = vmatprep.subr.bf16.mxu0 %v2102_v35  ;;  %993 = vmatprep.subr.bf16.mxu1 %v2106_v36 }
 0x36c   :  { %953 = vmatpush1.bf16.msra.mxu0 %v2109_v38  ;;  %994 = vmatpush1.bf16.msra.mxu1 %v2112_v39 }
 0x36d   :  { %954 = vmatprep.subr.bf16.mxu0 %v2116_v40  ;;  %995 = vmatprep.subr.bf16.mxu1 %v2119_v41 }
 0x370   :  { %955 = vmatpush1.bf16.msra.mxu0 %v2122_v42  ;;  %996 = vmatpush1.bf16.msra.mxu1 %v2134_v45 }
 0x371   :  { %956 = vmatprep.subr.bf16.mxu0 %v2136_v46  ;;  %997 = vmatprep.subr.bf16.mxu1 %v2140_v47 }
 0x374   :  { %957 = vmatpush1.bf16.msra.mxu0 %v2144_v49  ;;  %998 = vmatpush1.bf16.msra.mxu1 %v2148_v50 }
 0x375   :  { %958 = vmatprep.subr.bf16.mxu0 %v2150_v51  ;;  %999 = vmatprep.subr.bf16.mxu1 %v2153_v52 }
 0x378   :  { %959 = vmatpush1.bf16.msra.mxu0 %v2158_v53  ;;  %1000 = vmatpush1.bf16.msra.mxu1 %v2162_v54 }
 0x379   :  { %1059 = vmatprep.subr.bf16.mxu0 %v2035_v11  ;;  %1100 = vmatprep.subr.bf16.mxu1 %v2040_v14 }
 0x42e   :  { %v863_v23 = vpop.f32.mrb[28].mxu0  ;;  %v904_v6 = vpop.f32.mrb[28].mxu1 }
 0x42f   :  { %v911_v33 = vadd.f32 %v863_v23, %v2648_v15  ;;  %v913_v63 = vadd.f32 %v904_v6, %v2649_v62  ;;  %v865_v1 = vpop.f32.mrb[29].mxu0  ;;  %v906_v2 = vpop.f32.mrb[29].mxu1 }
 0x430   :  { %v912_v0 = vadd.f32 %v865_v1, %v2650_v3  ;;  %v914_v4 = vadd.f32 %v906_v2, %v2651_v56  ;;  %v867_v5 = vpop.f32.mrb[30].mxu0  ;;  %v908_v8 = vpop.f32.mrb[30].mxu1 }
 0x431   :  { %v1608_v13 = vmul.f32 -1.442695, %v911_v33  ;;  %v868_v12 = vpop.f32.mrb[31].mxu0  ;;  %v909_v7 = vpop.f32.mrb[31].mxu1  ;;  %v1610_v14 = vmul.f32 -1.442695, %v913_v63 }
 0x432   :  { %v1609_v11 = vmul.f32 -1.442695, %v912_v0 }
 0x433   :  { %1787 = vpow2.f32 %v1608_v13 }
 0x434   :  { %1789 = vpow2.f32 %v1609_v11 }
 0x435   :  { %1791 = vtanh.f32 %v914_v4 }
 0x436   :  { %1793 = vpow2.f32 %v1610_v14  ;;  %v2464_v14 = vld [vmem:[#allocation3] ss:$16 sps:$4 sm:$0xff]  }
 0x43d   :  { %v1788_v26 = vpop.eup %1787 }
 0x43e   :  { %v924_v44 = vadd.f32 1.0, %v1788_v26  ;;  %v1790_v22 = vpop.eup %1789  ;;  %v2467_v26 = vld [vmem:[#allocation3 + $0x8] ss:$16 sps:$4 sm:$0xff]  }
 0x43f   :  { %v925_v58 = vadd.f32 1.0, %v1790_v22  ;;  %v1792_v61 = vpop.eup %1791  ;;  %v2473_v22 = vld [vmem:[#allocation3 + $0x2c] ss:$16 sps:$4 sm:$0xff]  }
 0x440   :  { %1795 = vrcp.f32 %v924_v44  ;;  %v1794_v37 = vpop.eup %1793  ;;  %v2470_v44 = vld [vmem:[#allocation3 + $0x24] ss:$16 sps:$4 sm:$0xff]  }
 0x441   :  { %1797 = vrcp.f32 %v925_v58  ;;  %v926_v43 = vadd.f32 1.0, %v1794_v37  ;;  %v2478_v58 = vld [vmem:[#allocation3 + $0x20] ss:$16 sps:$4 sm:$0xff]   ;;  %v2484_v37 = vld [vmem:[#allocation3 + $0x44] ss:$16 sps:$4 sm:$0xff]  }
 0x443   :  { %1799 = vrcp.f32 %v926_v43  ;;  %v2496_v43 = vld [vmem:[#allocation3 + $0x64] ss:$16 sps:$4 sm:$0xff]  }
 0x44a   :  { %v1796_v10 = vpop.eup %1795 }
 0x44b   :  { %v935_v57 = vmul.f32 %v1796_v10, %v1792_v61  ;;  %v1798_v34 = vpop.eup %1797  ;;  %v2481_v61 = vld [vmem:[#allocation3 + $0x28] ss:$16 sps:$4 sm:$0xff]   ;;  %v2487_v10 = vld [vmem:[#allocation3 + $0x4c] ss:$16 sps:$4 sm:$0xff]  }
 0x44c   :  { %v934_v9 = vmul.f32 %v1798_v34, %v2373_v48  ;;  %v2493_v34 = vld [vmem:[#allocation3 + $0x48] ss:$16 sps:$4 sm:$0xff]  }
 0x44d   :  { %v1800_v59 = vpop.eup %1799 }
 0x44e   :  { %v2415_v60 = vadd.f32 %v935_v57, %v934_v9  ;;  %v2490_v57 = vld [vmem:[#allocation3 + $0x40] ss:$16 sps:$4 sm:$0xff]   ;;  %v2499_v9 = vld [vmem:[#allocation3 + $0x6c] ss:$16 sps:$4 sm:$0xff]  }
 0x450   :  { %1801 = vtanh.f32 %v2415_v60 }
 0x45a   :  { %v1802_v23 = vpop.eup %1801 }
 0x45b   :  { %v938_v6 = vmul.f32 %v1802_v23, %v1800_v59  ;;  %v2505_v59 = vld [vmem:[#allocation3 + $0x68] ss:$16 sps:$4 sm:$0xff]   ;;  %v2508_v23 = vld [vmem:[#allocation3 + $0x84] ss:$16 sps:$4 sm:$0xff]  }
 0x45d   :  { %v943_v15 = vpack.c.bf16 %v938_v6, %v938_v6  ;;  %v2511_v6 = vld [vmem:[#allocation3 + $0x8c] ss:$16 sps:$4 sm:$0xff]  }
 0x45f   :  { %977 = vmatmul.mubr.bf16.vlgmr.msra.gmra.mrb[32].mxu0 %v943_v15  ;;  %1018 = vmatmul.mubr.bf16.vlgmr.msra.gmra.mrb[32].mxu1 %v943_v15  ;;  %v2514_v15 = vld [vmem:[#allocation3 + $0x80] ss:$16 sps:$4 sm:$0xff]  }
 0x460   :  { %1060 = vmatpush1.bf16.msra.mxu0 %v2043_v16  ;;  %1101 = vmatpush1.bf16.msra.mxu1 %v2045_v17  ;;  %v2450_v16 = vld [vmem:[#allocation3 + $0x4] ss:$16 sps:$4 sm:$0xff]   ;;  %v2453_v17 = vld [vmem:[#allocation3 + $0xc] ss:$16 sps:$4 sm:$0xff]  }
 0x461   :  { %1061 = vmatprep.subr.bf16.mxu0 %v2048_v18  ;;  %1102 = vmatprep.subr.bf16.mxu1 %v2051_v19 }
 0x462   :  { %1091 = vmatprep.mubr.bf16.mxu0 %v2645_v55  ;;  %1132 = vmatprep.mubr.bf16.mxu1 %v2645_v55 }
 0x464   :  { %1062 = vmatpush1.bf16.msra.mxu0 %v2054_v20  ;;  %1103 = vmatpush1.bf16.msra.mxu1 %v2056_v21  ;;  %v2652_v20 = vld [vmem:[#allocation19_spill] sm:$0xff] }
 0x465   :  { %1063 = vmatprep.subr.bf16.mxu0 %v2068_v24  ;;  %1104 = vmatprep.subr.bf16.mxu1 %v2072_v25  ;;  %v2653_v24 = vld [vmem:[#allocation21_spill] sm:$0xff] }
 0x468   :  { %1064 = vmatpush1.bf16.msra.mxu0 %v2076_v27  ;;  %1105 = vmatpush1.bf16.msra.mxu1 %v2080_v28 }
 0x469   :  { %1065 = vmatprep.subr.bf16.mxu0 %v2082_v29  ;;  %1106 = vmatprep.subr.bf16.mxu1 %v2084_v30  ;;  %v2654_v29 = vld [vmem:[#allocation20_spill] sm:$0xff] }
 0x46c   :  { %1066 = vmatpush1.bf16.msra.mxu0 %v2087_v31  ;;  %1107 = vmatpush1.bf16.msra.mxu1 %v2090_v32  ;;  %v2655_v31 = vld [vmem:[#allocation23_spill] sm:$0xff] }
 0x46d   :  { %1067 = vmatprep.subr.bf16.mxu0 %v2102_v35  ;;  %1108 = vmatprep.subr.bf16.mxu1 %v2106_v36 }
 0x470   :  { %1068 = vmatpush1.bf16.msra.mxu0 %v2109_v38  ;;  %1109 = vmatpush1.bf16.msra.mxu1 %v2112_v39 }
 0x471   :  { %1069 = vmatprep.subr.bf16.mxu0 %v2116_v40  ;;  %1110 = vmatprep.subr.bf16.mxu1 %v2119_v41 }
 0x474   :  { %1070 = vmatpush1.bf16.msra.mxu0 %v2122_v42  ;;  %1111 = vmatpush1.bf16.msra.mxu1 %v2134_v45 }
 0x475   :  { %1071 = vmatprep.subr.bf16.mxu0 %v2136_v46  ;;  %1112 = vmatprep.subr.bf16.mxu1 %v2140_v47 }
 0x478   :  { %1072 = vmatpush1.bf16.msra.mxu0 %v2144_v49  ;;  %1113 = vmatpush1.bf16.msra.mxu1 %v2148_v50 }
 0x479   :  { %1073 = vmatprep.subr.bf16.mxu0 %v2150_v51  ;;  %1114 = vmatprep.subr.bf16.mxu1 %v2153_v52 }
 0x47c   :  { %1074 = vmatpush1.bf16.msra.mxu0 %v2158_v53  ;;  %1115 = vmatpush1.bf16.msra.mxu1 %v2162_v54 }
 0x47d   :  { %1174 = vmatprep.subr.bf16.mxu0 %v2450_v16  ;;  %1215 = vmatprep.subr.bf16.mxu1 %v2453_v17 }
 0x532   :  { %v978_v18 = vpop.f32.mrb[32].mxu0  ;;  %v1019_v19 = vpop.f32.mrb[32].mxu1 }
 0x533   :  { %v1026_v21 = vadd.f32 %v978_v18, %v2652_v20  ;;  %v1028_v25 = vadd.f32 %v1019_v19, %v2653_v24  ;;  %v980_v27 = vpop.f32.mrb[33].mxu0  ;;  %v1021_v28 = vpop.f32.mrb[33].mxu1  ;;  %v2517_v18 = vld [vmem:[#allocation3 + $0x88] ss:$16 sps:$4 sm:$0xff]   ;;  %v2520_v19 = vld [vmem:[#allocation3 + $0xa4] ss:$16 sps:$4 sm:$0xff]  }
 0x534   :  { %v1027_v30 = vadd.f32 %v980_v27, %v2654_v29  ;;  %v1029_v32 = vadd.f32 %v1021_v28, %v2655_v31  ;;  %v982_v35 = vpop.f32.mrb[34].mxu0  ;;  %v1023_v36 = vpop.f32.mrb[34].mxu1  ;;  %v2523_v20 = vld [vmem:[#allocation3 + $0xac] ss:$16 sps:$4 sm:$0xff]  }
 0x535   :  { %v1611_v38 = vmul.f32 -1.442695, %v1026_v21  ;;  %v983_v39 = vpop.f32.mrb[35].mxu0  ;;  %v1024_v40 = vpop.f32.mrb[35].mxu1  ;;  %v1613_v42 = vmul.f32 -1.442695, %v1028_v25 }
 0x536   :  { %v1612_v41 = vmul.f32 -1.442695, %v1027_v30  ;;  %v2526_v21 = vld [vmem:[#allocation3 + $0xa0] ss:$16 sps:$4 sm:$0xff]   ;;  %v2656_v24 = vld [vmem:[#allocation22_spill] sm:$0xff]  ;;  %v2658_v28 = vld [vmem:[#allocation24_spill] sm:$0xff] }
 0x537   :  { %1803 = vpow2.f32 %v1611_v38  ;;  %v2657_v25 = vld [vmem:[#allocation25_spill] sm:$0xff]  ;;  %v2659_v29 = vld [vmem:[#allocation26_spill] sm:$0xff] }
 0x538   :  { %1805 = vpow2.f32 %v1612_v41 }
 0x539   :  { %1807 = vtanh.f32 %v1029_v32 }
 0x53a   :  { %1809 = vpow2.f32 %v1613_v42 }
 0x541   :  { %v1804_v48 = vpop.eup %1803 }
 0x542   :  { %v1039_v33 = vadd.f32 1.0, %v1804_v48  ;;  %v1806_v62 = vpop.eup %1805 }
 0x543   :  { %v1040_v63 = vadd.f32 1.0, %v1806_v62  ;;  %v1808_v1 = vpop.eup %1807 }
 0x544   :  { %1811 = vrcp.f32 %v1039_v33  ;;  %v1810_v2 = vpop.eup %1809 }
 0x545   :  { %1813 = vrcp.f32 %v1040_v63  ;;  %v1041_v4 = vadd.f32 1.0, %v1810_v2 }
 0x547   :  { %1815 = vrcp.f32 %v1041_v4  ;;  %v1893_v4 = vld [vmem:[#allocation3 + $0xc4] ss:$16 sps:$4 sm:$0xff]  }
 0x54e   :  { %v1812_v3 = vpop.eup %1811 }
 0x54f   :  { %v1050_v0 = vmul.f32 %v1812_v3, %v1808_v1  ;;  %v1814_v56 = vpop.eup %1813 }
 0x550   :  { %v1049_v5 = vmul.f32 %v1814_v56, %v2415_v60  ;;  %v2502_v60 = vld [vmem:[#allocation3 + $0x60] ss:$16 sps:$4 sm:$0xff]  }
 0x551   :  { %v1816_v13 = vpop.eup %1815 }
 0x552   :  { %v2461_v8 = vadd.f32 %v1050_v0, %v1049_v5  ;;  %v1894_v5 = vld [vmem:[#allocation3 + $0xcc] ss:$16 sps:$4 sm:$0xff]  }
 0x554   :  { %1817 = vtanh.f32 %v2461_v8 }
 0x55e   :  { %v1818_v12 = vpop.eup %1817 }
 0x55f   :  { %v1053_v7 = vmul.f32 %v1818_v12, %v1816_v13  ;;  %v1896_v13 = vld [vmem:[#allocation3 + $0xc8] ss:$16 sps:$4 sm:$0xff]   ;;  %v1897_v12 = vld [vmem:[#allocation3 + $0xe4] ss:$16 sps:$4 sm:$0xff]  }
 0x561   :  { %v1058_v11 = vpack.c.bf16 %v1053_v7, %v1053_v7  ;;  %v1898_v7 = vld [vmem:[#allocation3 + $0xec] ss:$16 sps:$4 sm:$0xff]  }
 0x563   :  { %1092 = vmatmul.mubr.bf16.vlgmr.msra.gmra.mrb[36].mxu0 %v1058_v11  ;;  %1133 = vmatmul.mubr.bf16.vlgmr.msra.gmra.mrb[36].mxu1 %v1058_v11  ;;  %v1899_v11 = vld [vmem:[#allocation3 + $0xe0] ss:$16 sps:$4 sm:$0xff]  }
 0x564   :  { %1175 = vmatpush1.bf16.msra.mxu0 %v2464_v14  ;;  %1216 = vmatpush1.bf16.msra.mxu1 %v2467_v26 }
 0x565   :  { %1176 = vmatprep.subr.bf16.mxu0 %v2470_v44  ;;  %1217 = vmatprep.subr.bf16.mxu1 %v2473_v22 }
 0x566   :  { %1206 = vmatprep.mubr.bf16.mxu0 %v2645_v55  ;;  %1247 = vmatprep.mubr.bf16.mxu1 %v2645_v55 }
 0x568   :  { %1177 = vmatpush1.bf16.msra.mxu0 %v2478_v58  ;;  %1218 = vmatpush1.bf16.msra.mxu1 %v2481_v61 }
 0x569   :  { %1178 = vmatprep.subr.bf16.mxu0 %v2484_v37  ;;  %1219 = vmatprep.subr.bf16.mxu1 %v2487_v10 }
 0x56c   :  { %1179 = vmatpush1.bf16.msra.mxu0 %v2490_v57  ;;  %1220 = vmatpush1.bf16.msra.mxu1 %v2493_v34 }
 0x56d   :  { %1180 = vmatprep.subr.bf16.mxu0 %v2496_v43  ;;  %1221 = vmatprep.subr.bf16.mxu1 %v2499_v9 }
 0x570   :  { %1181 = vmatpush1.bf16.msra.mxu0 %v2502_v60  ;;  %1222 = vmatpush1.bf16.msra.mxu1 %v2505_v59 }
 0x571   :  { %1182 = vmatprep.subr.bf16.mxu0 %v2508_v23  ;;  %1223 = vmatprep.subr.bf16.mxu1 %v2511_v6 }
 0x574   :  { %1183 = vmatpush1.bf16.msra.mxu0 %v2514_v15  ;;  %1224 = vmatpush1.bf16.msra.mxu1 %v2517_v18 }
 0x575   :  { %1184 = vmatprep.subr.bf16.mxu0 %v2520_v19  ;;  %1225 = vmatprep.subr.bf16.mxu1 %v2523_v20 }
 0x578   :  { %1185 = vmatpush1.bf16.msra.mxu0 %v2526_v21  ;;  %1226 = vmatpush1.bf16.msra.mxu1 %v2134_v45 }
 0x579   :  { %1186 = vmatprep.subr.bf16.mxu0 %v2136_v46  ;;  %1227 = vmatprep.subr.bf16.mxu1 %v2140_v47 }
 0x57c   :  { %1187 = vmatpush1.bf16.msra.mxu0 %v2144_v49  ;;  %1228 = vmatpush1.bf16.msra.mxu1 %v2148_v50 }
 0x57d   :  { %1188 = vmatprep.subr.bf16.mxu0 %v2150_v51  ;;  %1229 = vmatprep.subr.bf16.mxu1 %v2153_v52 }
 0x580   :  { %1189 = vmatpush1.bf16.msra.mxu0 %v2158_v53  ;;  %1230 = vmatpush1.bf16.msra.mxu1 %v2162_v54 }
 0x581   :  { %1289 = vmatprep.subr.bf16.mxu0 %v2450_v16  ;;  %1330 = vmatprep.subr.bf16.mxu1 %v2453_v17 }
 0x636   :  { %v1093_v45 = vpop.f32.mrb[36].mxu0  ;;  %v1134_v46 = vpop.f32.mrb[36].mxu1 }
 0x637   :  { %v1141_v47 = vadd.f32 %v1093_v45, %v2656_v24  ;;  %v1143_v49 = vadd.f32 %v1134_v46, %v2657_v25  ;;  %v1095_v27 = vpop.f32.mrb[37].mxu0  ;;  %v1136_v50 = vpop.f32.mrb[37].mxu1 }
 0x638   :  { %v1142_v51 = vadd.f32 %v1095_v27, %v2658_v28  ;;  %v1144_v52 = vadd.f32 %v1136_v50, %v2659_v29  ;;  %v1097_v30 = vpop.f32.mrb[38].mxu0  ;;  %v1138_v53 = vpop.f32.mrb[38].mxu1 }
 0x639   :  { %v1614_v31 = vmul.f32 -1.442695, %v1141_v47  ;;  %v1098_v54 = vpop.f32.mrb[39].mxu0  ;;  %v1139_v32 = vpop.f32.mrb[39].mxu1  ;;  %v1616_v17 = vmul.f32 -1.442695, %v1143_v49 }
 0x63a   :  { %v1615_v16 = vmul.f32 -1.442695, %v1142_v51  ;;  %v1401_v54 = vld [vmem:[#allocation6 + $0x40] sm:$0xff] }
 0x63b   :  { %1819 = vpow2.f32 %v1614_v31  ;;  %v1402_v32 = vld [vmem:[#allocation6 + $0x60] sm:$0xff] }
 0x63c   :  { %1821 = vpow2.f32 %v1615_v16  ;;  %v1417_v16 = vpack.c.bf16 %v1402_v32, %v1401_v54 }
 0x63d   :  { %1823 = vtanh.f32 %v1144_v52 }
 0x63e   :  { %1825 = vpow2.f32 %v1616_v17  ;;  %v1980_v17 = vmov 0.0  }
 0x645   :  { %v1820_v35 = vpop.eup %1819 }
 0x646   :  { %v1154_v36 = vadd.f32 1.0, %v1820_v35  ;;  %v1822_v38 = vpop.eup %1821  ;;  %v1403_v35 = vld [vmem:[#allocation6 + $0x80] sm:$0xff] }
 0x647   :  { %v1155_v39 = vadd.f32 1.0, %v1822_v38  ;;  %v1824_v40 = vpop.eup %1823 }
 0x648   :  { %1827 = vrcp.f32 %v1154_v36  ;;  %v1826_v41 = vpop.eup %1825  ;;  %v1404_v36 = vld [vmem:[#allocation6 + $0xa0] sm:$0xff] }
 0x649   :  { %1829 = vrcp.f32 %v1155_v39  ;;  %v1156_v62 = vadd.f32 1.0, %v1826_v41  ;;  %v1418_v38 = vpack.c.bf16 %v1404_v36, %v1403_v35  ;;  %v1405_v39 = vld [vmem:[#allocation6 + $0xc0] sm:$0xff] }
 0x64b   :  { %1831 = vrcp.f32 %v1156_v62  ;;  %v1409_v62 = vld [vmem:[#allocation6 + $0x140] sm:$0xff] }
 0x652   :  { %v1828_v42 = vpop.eup %1827 }
 0x653   :  { %v1165_v48 = vmul.f32 %v1828_v42, %v1824_v40  ;;  %v1830_v33 = vpop.eup %1829  ;;  %v1406_v40 = vld [vmem:[#allocation6 + $0xe0] sm:$0xff] }
 0x654   :  { %v1164_v63 = vmul.f32 %v1830_v33, %v2461_v8  ;;  %v1895_v8 = vld [vmem:[#allocation3 + $0xc0] ss:$16 sps:$4 sm:$0xff]   ;;  %v1419_v41 = vpack.c.bf16 %v1406_v40, %v1405_v39 }
 0x655   :  { %v1832_v2 = vpop.eup %1831  ;;  %v1407_v42 = vld [vmem:[#allocation6 + $0x100] sm:$0xff] }
 0x656   :  { %v2545_v1 = vadd.f32 %v1165_v48, %v1164_v63  ;;  %v1408_v48 = vld [vmem:[#allocation6 + $0x120] sm:$0xff] }
 0x657   :  { %v1420_v33 = vpack.c.bf16 %v1408_v48, %v1407_v42  ;;  %v1410_v63 = vld [vmem:[#allocation6 + $0x160] sm:$0xff]  ;;  %v1433_v42 = vld [vmem:[#allocation6 + $0x148] sm:$0xff] }
 0x658   :  { %1833 = vtanh.f32 %v2545_v1  ;;  %v1434_v48 = vld [vmem:[#allocation6 + $0x168] sm:$0xff] }
 0x662   :  { %v1834_v3 = vpop.eup %1833 }
 0x663   :  { %v1168_v0 = vmul.f32 %v1834_v3, %v1832_v2  ;;  %v1411_v2 = vld [vmem:[#allocation6 + $0x180] sm:$0xff] }
 0x664   :  { %v1412_v3 = vld [vmem:[#allocation6 + $0x1a0] sm:$0xff] }
 0x665   :  { %v1173_v56 = vpack.c.bf16 %v1168_v0, %v1168_v0  ;;  %v1422_v0 = vpack.c.bf16 %v1412_v3, %v1411_v2  ;;  %v1438_v2 = vld [vmem:[#allocation6 + $0x1e8] sm:$0xff] }
 0x667   :  { %1207 = vmatmul.mubr.bf16.vlgmr.msra.gmra.mrb[40].mxu0 %v1173_v56  ;;  %1248 = vmatmul.mubr.bf16.vlgmr.msra.gmra.mrb[40].mxu1 %v1173_v56  ;;  %v1413_v56 = vld [vmem:[#allocation6 + $0x1c0] sm:$0xff] }
 0x668   :  { %1290 = vmatpush1.bf16.msra.mxu0 %v2464_v14  ;;  %1331 = vmatpush1.bf16.msra.mxu1 %v2467_v26  ;;  %v1900_v14 = vld [vmem:[#allocation3 + $0xe8] ss:$16 sps:$4 sm:$0xff]  }
 0x669   :  { %1291 = vmatprep.subr.bf16.mxu0 %v2470_v44  ;;  %1332 = vmatprep.subr.bf16.mxu1 %v2473_v22  ;;  %v2660_v22 = vld [vmem:[#allocation27_spill] sm:$0xff] }
 0x66a   :  { %1321 = vmatprep.mubr.bf16.mxu0 %v2645_v55  ;;  %1362 = vmatprep.mubr.bf16.mxu1 %v2645_v55  ;;  %v1892_v55 = vld [vmem:[#allocation3 + $0xa8] ss:$16 sps:$4 sm:$0xff]  }
 0x66c   :  { %1292 = vmatpush1.bf16.msra.mxu0 %v2478_v58  ;;  %1333 = vmatpush1.bf16.msra.mxu1 %v2481_v61  ;;  %v2661_v61 = vld [vmem:[#allocation29_spill] sm:$0xff] }
 0x66d   :  { %1293 = vmatprep.subr.bf16.mxu0 %v2484_v37  ;;  %1334 = vmatprep.subr.bf16.mxu1 %v2487_v10 }
 0x670   :  { %1294 = vmatpush1.bf16.msra.mxu0 %v2490_v57  ;;  %1335 = vmatpush1.bf16.msra.mxu1 %v2493_v34  ;;  %v2662_v34 = vld [vmem:[#allocation28_spill] sm:$0xff] }
 0x671   :  { %1295 = vmatprep.subr.bf16.mxu0 %v2496_v43  ;;  %1336 = vmatprep.subr.bf16.mxu1 %v2499_v9  ;;  %v2663_v9 = vld [vmem:[#allocation31_spill] sm:$0xff] }
 0x674   :  { %1296 = vmatpush1.bf16.msra.mxu0 %v2502_v60  ;;  %1337 = vmatpush1.bf16.msra.mxu1 %v2505_v59 }
 0x675   :  { %1297 = vmatprep.subr.bf16.mxu0 %v2508_v23  ;;  %1338 = vmatprep.subr.bf16.mxu1 %v2511_v6 }
 0x678   :  { %1298 = vmatpush1.bf16.msra.mxu0 %v2514_v15  ;;  %1339 = vmatpush1.bf16.msra.mxu1 %v2517_v18 }
 0x679   :  { %1299 = vmatprep.subr.bf16.mxu0 %v2520_v19  ;;  %1340 = vmatprep.subr.bf16.mxu1 %v2523_v20 }
 0x67c   :  { %1300 = vmatpush1.bf16.msra.mxu0 %v2526_v21  ;;  %1341 = vmatpush1.bf16.msra.mxu1 %v1892_v55  ;;  %v1414_v55 = vld [vmem:[#allocation6 + $0x1e0] sm:$0xff] }
 0x67d   :  { %1301 = vmatprep.subr.bf16.mxu0 %v1893_v4  ;;  %1342 = vmatprep.subr.bf16.mxu1 %v1894_v5  ;;  %v1423_v4 = vpack.c.bf16 %v1414_v55, %v1413_v56  ;;  %v1415_v5 = vld [vmem:[#allocation6 + $0x200] sm:$0xff]  ;;  %v1440_v56 = vld [vmem:[#allocation6 + $0x228] sm:$0xff] }
 0x680   :  { %1302 = vmatpush1.bf16.msra.mxu0 %v1895_v8  ;;  %1343 = vmatpush1.bf16.msra.mxu1 %v1896_v13  ;;  %v1416_v8 = vld [vmem:[#allocation6 + $0x220] sm:$0xff] }
 0x681   :  { %1303 = vmatprep.subr.bf16.mxu0 %v1897_v12  ;;  %1344 = vmatprep.subr.bf16.mxu1 %v1898_v7  ;;  %v1424_v13 = vpack.c.bf16 %v1416_v8, %v1415_v5  ;;  %v1425_v12 = vld [vmem:[#allocation6 + $0x48] sm:$0xff]  ;;  %v1399_v8 = vld [vmem:[#allocation6] sm:$0xff] }
 0x682   :  { %v1426_v7 = vld [vmem:[#allocation6 + $0x68] sm:$0xff] }
 0x684   :  { %1304 = vmatpush1.bf16.msra.mxu0 %v1899_v11  ;;  %1345 = vmatpush1.bf16.msra.mxu1 %v1900_v14  ;;  %v1427_v11 = vld [vmem:[#allocation6 + $0x88] sm:$0xff]  ;;  %v1441_v14 = vpack.c.bf16 %v1426_v7, %v1425_v12 }
 0x685   :  { %1641 = vmatprep.subr.bf16.mxu0 %v1980_v17  ;;  %1661 = vmatprep.subr.bf16.mxu1 %v1980_v17 }
 0x73a   :  { %v1208_v26 = vpop.f32.mrb[40].mxu0  ;;  %v1249_v44 = vpop.f32.mrb[40].mxu1 }
 0x73b   :  { %v1256_v58 = vadd.f32 %v1208_v26, %v2660_v22  ;;  %v1258_v37 = vadd.f32 %v1249_v44, %v2661_v61  ;;  %v1210_v10 = vpop.f32.mrb[41].mxu0  ;;  %v1251_v57 = vpop.f32.mrb[41].mxu1  ;;  %v1428_v26 = vld [vmem:[#allocation6 + $0xa8] sm:$0xff] }
 0x73c   :  { %v1257_v43 = vadd.f32 %v1210_v10, %v2662_v34  ;;  %v1259_v60 = vadd.f32 %v1251_v57, %v2663_v9  ;;  %v1212_v59 = vpop.f32.mrb[42].mxu0  ;;  %v1253_v23 = vpop.f32.mrb[42].mxu1  ;;  %v1442_v44 = vpack.c.bf16 %v1428_v26, %v1427_v11  ;;  %v1429_v22 = vld [vmem:[#allocation6 + $0xc8] sm:$0xff]  ;;  %v2664_v9 = vld [vmem:[#allocation30_spill] sm:$0xff] }
 0x73d   :  { %v1617_v6 = vmul.f32 -1.442695, %v1256_v58  ;;  %v1213_v15 = vpop.f32.mrb[43].mxu0  ;;  %v1254_v18 = vpop.f32.mrb[43].mxu1  ;;  %v1619_v20 = vmul.f32 -1.442695, %v1258_v37 }
 0x73e   :  { %v1618_v19 = vmul.f32 -1.442695, %v1257_v43  ;;  %v1430_v58 = vld [vmem:[#allocation6 + $0xe8] sm:$0xff]  ;;  %v2665_v59 = vld [vmem:[#allocation33_spill] sm:$0xff] }
 0x73f   :  { %1835 = vpow2.f32 %v1617_v6  ;;  %v1443_v61 = vpack.c.bf16 %v1430_v58, %v1429_v22  ;;  %v1431_v37 = vld [vmem:[#allocation6 + $0x108] sm:$0xff] }
 0x740   :  { %1837 = vpow2.f32 %v1618_v19  ;;  %v1432_v10 = vld [vmem:[#allocation6 + $0x128] sm:$0xff] }
 0x741   :  { %1839 = vtanh.f32 %v1259_v60  ;;  %v1444_v57 = vpack.c.bf16 %v1432_v10, %v1431_v37  ;;  %v2666_v18 = vld [vmem:[#allocation32_spill] sm:$0xff] }
 0x742   :  { %1841 = vpow2.f32 %v1619_v20  ;;  %v2667_v20 = vld [vmem:[#allocation34_spill] sm:$0xff]  ;;  %v1400_v58 = vld [vmem:[#allocation6 + $0x8] sm:$0xff] }
 0x749   :  { %v1836_v21 = vpop.eup %1835 }
 0x74a   :  { %v1269_v45 = vadd.f32 1.0, %v1836_v21  ;;  %v1838_v46 = vpop.eup %1837 }
 0x74b   :  { %v1270_v24 = vadd.f32 1.0, %v1838_v46  ;;  %v1840_v47 = vpop.eup %1839 }
 0x74c   :  { %1843 = vrcp.f32 %v1269_v45  ;;  %v1842_v25 = vpop.eup %1841 }
 0x74d   :  { %1845 = vrcp.f32 %v1270_v24  ;;  %v1271_v28 = vadd.f32 1.0, %v1842_v25 }
 0x74f   :  { %1847 = vrcp.f32 %v1271_v28 }
 0x756   :  { %v1844_v49 = vpop.eup %1843 }
 0x757   :  { %v1280_v27 = vmul.f32 %v1844_v49, %v1840_v47  ;;  %v1846_v50 = vpop.eup %1845 }
 0x758   :  { %v1279_v51 = vmul.f32 %v1846_v50, %v2545_v1  ;;  %v1421_v1 = vpack.c.bf16 %v1410_v63, %v1409_v62  ;;  %v1435_v62 = vld [vmem:[#allocation6 + $0x188] sm:$0xff] }
 0x759   :  { %v1848_v52 = vpop.eup %1847  ;;  %v1436_v63 = vld [vmem:[#allocation6 + $0x1a8] sm:$0xff] }
 0x75a   :  { %v2576_v29 = vadd.f32 %v1280_v27, %v1279_v51 }
 0x75c   :  { %1849 = vtanh.f32 %v2576_v29 }
 0x766   :  { %v1850_v30 = vpop.eup %1849 }
 0x767   :  { %v1283_v53 = vmul.f32 %v1850_v30, %v1848_v52 }
 0x769   :  { %v1288_v31 = vpack.c.bf16 %v1283_v53, %v1283_v53 }
 0x76b   :  { %1322 = vmatmul.mubr.bf16.vlgmr.msra.gmra.mrb[44].mxu0 %v1288_v31  ;;  %1363 = vmatmul.mubr.bf16.vlgmr.msra.gmra.mrb[44].mxu1 %v1288_v31 }
 0x76c   :  { %1642 = vmatpush3.bf16.msra.mxu0 %v1417_v16  ;;  %1657 = vmatprep.mubr.msk.bf16.mxu0 %vm1981_vm2, %v1980_v17 }
 0x76d   :  { %1643 = vmatprep.subr.bf16.mxu0 %v1980_v17  ;;  %1677 = vmatprep.mubr.msk.bf16.mxu1 %vm1981_vm2, %v1980_v17 }
 0x76e   :  { %1662 = vmatpush3.bf16.msra.mxu1 %v1441_v14 }
 0x76f   :  { %1663 = vmatprep.subr.bf16.mxu1 %v1980_v17 }
 0x770   :  { %1644 = vmatpush3.bf16.msra.mxu0 %v1418_v38 }
 0x771   :  { %1645 = vmatprep.subr.bf16.mxu0 %v1980_v17 }
 0x772   :  { %1664 = vmatpush3.bf16.msra.mxu1 %v1442_v44 }
 0x773   :  { %1665 = vmatprep.subr.bf16.mxu1 %v1980_v17 }
 0x774   :  { %1646 = vmatpush3.bf16.msra.mxu0 %v1419_v41 }
 0x775   :  { %1647 = vmatprep.subr.bf16.mxu0 %v1980_v17 }
 0x776   :  { %1666 = vmatpush3.bf16.msra.mxu1 %v1443_v61 }
 0x777   :  { %1667 = vmatprep.subr.bf16.mxu1 %v1980_v17 }
 0x778   :  { %1648 = vmatpush3.bf16.msra.mxu0 %v1420_v33  ;;  %v1445_v33 = vpack.c.bf16 %v1434_v48, %v1433_v42 }
 0x779   :  { %1649 = vmatprep.subr.bf16.mxu0 %v1980_v17 }
 0x77a   :  { %1668 = vmatpush3.bf16.msra.mxu1 %v1444_v57 }
 0x77b   :  { %1669 = vmatprep.subr.bf16.mxu1 %v1980_v17 }
 0x77c   :  { %1650 = vmatpush3.bf16.msra.mxu0 %v1421_v1  ;;  %v1446_v1 = vpack.c.bf16 %v1436_v63, %v1435_v62 }
 0x77d   :  { %1651 = vmatprep.subr.bf16.mxu0 %v1980_v17 }
 0x77e   :  { %1670 = vmatpush3.bf16.msra.mxu1 %v1445_v33 }
 0x77f   :  { %1671 = vmatprep.subr.bf16.mxu1 %v1980_v17 }
 0x780   :  { %1652 = vmatpush3.bf16.msra.mxu0 %v1422_v0  ;;  %v1439_v0 = vld [vmem:[#allocation6 + $0x208] sm:$0xff] }
 0x781   :  { %1653 = vmatprep.subr.bf16.mxu0 %v1980_v17  ;;  %v1448_v55 = vpack.c.bf16 %v1440_v56, %v1439_v0 }
 0x782   :  { %1672 = vmatpush3.bf16.msra.mxu1 %v1446_v1 }
 0x783   :  { %1673 = vmatprep.subr.bf16.mxu1 %v1980_v17 }
 0x784   :  { %1654 = vmatpush3.bf16.msra.mxu0 %v1423_v4  ;;  %v2668_v4 = vld [vmem:[#allocation12_spill] sm:$0xff] }
 0x785   :  { %1655 = vmatprep.subr.bf16.mxu0 %v1980_v17  ;;  %v1452_v5 = vsub.s32 1, %v2668_v4 }
 0x787   :  { %v1499_v61 = vrot.slane %v1400_v58, %v1452_v5 }
 0x788   :  { %1656 = vmatpush3.bf16.msra.mxu0 %v1424_v13  ;;  %v1453_v13 = vrot.slane %v1399_v8, %v1452_v5 }
 0x83e   :  { %v1323_v34 = vpop.f32.mrb[44].mxu0  ;;  %v1364_v43 = vpop.f32.mrb[44].mxu1 }
 0x83f   :  { %v1371_v60 = vadd.f32 %v1323_v34, %v2664_v9  ;;  %v1373_v23 = vadd.f32 %v1364_v43, %v2665_v59  ;;  %v1325_v6 = vpop.f32.mrb[45].mxu0  ;;  %v1366_v15 = vpop.f32.mrb[45].mxu1 }
 0x840   :  { %v1372_v19 = vadd.f32 %v1325_v6, %v2666_v18  ;;  %v1374_v21 = vadd.f32 %v1366_v15, %v2667_v20  ;;  %v1327_v45 = vpop.f32.mrb[46].mxu0  ;;  %v1368_v46 = vpop.f32.mrb[46].mxu1 }
 0x841   :  { %v1620_v24 = vmul.f32 -1.442695, %v1371_v60  ;;  %v1328_v47 = vpop.f32.mrb[47].mxu0  ;;  %v1369_v25 = vpop.f32.mrb[47].mxu1  ;;  %v1622_v27 = vmul.f32 -1.442695, %v1373_v23 }
 0x842   :  { %v1621_v49 = vmul.f32 -1.442695, %v1372_v19 }
 0x843   :  { %1851 = vpow2.f32 %v1620_v24 }
 0x844   :  { %1853 = vpow2.f32 %v1621_v49 }
 0x845   :  { %1855 = vtanh.f32 %v1374_v21 }
 0x846   :  { %1857 = vpow2.f32 %v1622_v27 }
 0x84d   :  { %v1852_v50 = vpop.eup %1851 }
 0x84e   :  { %v1384_v28 = vadd.f32 1.0, %v1852_v50  ;;  %v1854_v51 = vpop.eup %1853 }
 0x84f   :  { %v1385_v52 = vadd.f32 1.0, %v1854_v51  ;;  %v1856_v30 = vpop.eup %1855 }
 0x850   :  { %1859 = vrcp.f32 %v1384_v28  ;;  %v1858_v53 = vpop.eup %1857 }
 0x851   :  { %1861 = vrcp.f32 %v1385_v52  ;;  %v1386_v16 = vadd.f32 1.0, %v1858_v53 }
 0x853   :  { %1863 = vrcp.f32 %v1386_v16 }
 0x85a   :  { %v1860_v31 = vpop.eup %1859 }
 0x85b   :  { %v1395_v54 = vmul.f32 %v1860_v31, %v1856_v30  ;;  %v1862_v32 = vpop.eup %1861 }
 0x85c   :  { %v1394_v35 = vmul.f32 %v1862_v32, %v2576_v29  ;;  %v1437_v29 = vld [vmem:[#allocation6 + $0x1c8] sm:$0xff] }
 0x85d   :  { %v1864_v38 = vpop.eup %1863  ;;  %v1447_v3 = vpack.c.bf16 %v1438_v2, %v1437_v29 }
 0x85e   :  { %v1396_v36 = vadd.f32 %v1395_v54, %v1394_v35 }
 0x85f   :  { %1674 = vmatpush3.bf16.msra.mxu1 %v1447_v3 }
 0x860   :  { %1865 = vtanh.f32 %v1396_v36  ;;  %1675 = vmatprep.subr.bf16.mxu1 %v1980_v17 }
 0x863   :  { %1676 = vmatpush3.bf16.msra.mxu1 %v1448_v55 }
 0x86a   :  { %v1866_v39 = vpop.eup %1865 }
 0x86b   :  { %v1398_v40 = vmul.f32 %v1866_v39, %v1864_v38 }
 0x86d   :  { %v1449_v41 = vpack.c.bf16 %v1398_v40, %v1398_v40 }
 0x86f   :  { %1658 = vmatmul.mubr.bf16.vlgmr.msra.gmra.mrb[48].mxu0 %v1449_v41 }
 0x942   :  { %v1488_v12 = vpop.f32.mrb[48].mxu0 }
 0x943   :  { %v1489_v7 = vadd.f32 %v1488_v12, %v1453_v13  ;;  %v1659_v11 = vpop.f32.mrb[49].mxu0 }
 0x944   :  { %v1491_v14 = vpop.f32.mrb[50].mxu0 }
 0x945   :  { %1867 = vtanh.f32 %v1489_v7  ;;  %v1660_v26 = vpop.f32.mrb[51].mxu0 }
 0x94f   :  { %v1868_v44 = vpop.eup %1867 }
 0x950   :  { %v1495_v22 = vpack.c.bf16 %v1868_v44, %v1868_v44 }
 0x952   :  { %1678 = vmatmul.mubr.bf16.vlgmr.msra.gmra.mrb[48].mxu1 %v1495_v22 }
 0xa25   :  { %v1534_v17 = vpop.f32.mrb[48].mxu1 }
 0xa26   :  { %v1535_v37 = vadd.f32 %v1534_v17, %v1499_v61  ;;  %v1679_v10 = vpop.f32.mrb[49].mxu1 }
 0xa27   :  { %v1537_v57 = vpop.f32.mrb[50].mxu1 }
 0xa28   :  { %1540 = vst [vmem:[#allocation8] sm:$0xff] %v1535_v37  ;;  %v1680_v34 = vpop.f32.mrb[51].mxu1 }
 0xa29   :  { %1956 = shalt.err (!%p1953_p6)
}
 0xa2a   :  { %s1957_s4 = scalar_lea.hbm %s2618_s3, 128 }
 0xa2b   :  { %p1958_p7 = scmp.ne.s32.totalorder %s2618_s3, %s1957_s4  ;;  %p1961_p8 = scmp.lt.u32.totalorder %s1957_s4, %s2618_s3 }
 0xa2d   :  { %p1963_p9 = pnand %p1961_p8, %p1958_p7 }
 0xa2f   :  { %1966 = shalt.err (!%p1963_p9)
}
 0xa30   :  { %1550 = dma.vmem_to_hbm [thread:$0]  %s1548_s27, 128, %s2618_s3, [#allocation5]  }
 0xa31   :  { %1971 = dma.done.wait [#allocation5], 128  }
 0xa32   :  { %1972 = vsyncadd [#allocation5], 4294967168 }
 0xa33   :  { %1554 = vsyncpa [#allocation4], 1 }
 0xa34   :  { %1555 = vsyncpa [#allocation7], 1 }
 0xa35   :  { %1556 = vsyncpa [#allocation5], 1 }

</bundles_post_ra>
